<compile_context>
chip_gen: v7x
topology: tpu7x:2x2x1
jax: 0.10.0
libtpu: 0.0.40
codegen_flags: <defaults>
</compile_context>

<pallas_src>
import functools

import jax
import jax.numpy as jnp
from jax import lax
from jax.experimental import pallas as pl
from jax.experimental.pallas import tpu as pltpu


def _encoder_kernel(S, B, V, E, H, L, *refs):
    # refs layout:
    #   inputs : ids (S,B) i32, table (V,E), h0 (L,B,H), c0 (L,B,H),
    #            then per layer: w_ih_T (in_l,4H), w_hh_T (H,4H), bias (1,4H)
    #   outputs: out (S,B,H), h_n (L,B,H), c_n (L,B,H)
    #   scratch: y_buf (S,B,H) inter-layer handoff,
    #            gx_buf (S,B,4H) hoisted input projection of the current layer
    idx = 0
    ids_ref = refs[idx]; idx += 1
    table_ref = refs[idx]; idx += 1
    h0_ref = refs[idx]; idx += 1
    c0_ref = refs[idx]; idx += 1
    layer_refs = []
    for _ in range(L):
        layer_refs.append((refs[idx], refs[idx + 1], refs[idx + 2]))
        idx += 3
    out_ref, hn_ref, cn_ref = refs[idx], refs[idx + 1], refs[idx + 2]
    y_buf, gx_buf = refs[idx + 3], refs[idx + 4]

    # ---- Embedding lookup: one flattened one-hot matmul on the MXU ----------
    # TODO(synk): for large vocabularies keep the table in HBM
    # (BlockSpec(memory_space=pl.ANY)) and DMA-gather the S*B needed rows
    # instead of materializing a (S*B, V) one-hot and the full table in VMEM.
    ids = ids_ref[...]                                              # (S, B) int32
    iota_v = lax.broadcasted_iota(jnp.int32, (S, B, V), 2)
    onehot = (ids[:, :, None] == iota_v).astype(jnp.float32)        # (S, B, V)
    x_in = jnp.dot(onehot.reshape(S * B, V), table_ref[...],
                   preferred_element_type=jnp.float32)              # (S*B, E)

    # ---- Stacked LSTM (gate order i, f, g, o — PyTorch convention) ----------
    for l in range(L):
        w_ih_T_ref, w_hh_T_ref, b_ref = layer_refs[l]
        w_hh_T = w_hh_T_ref[...]                                    # (H, 4H)
        is_last = (l == L - 1)

        if l > 0:
            # Previous layer's hidden states become this layer's inputs.
            x_in = y_buf[...].reshape(S * B, H)

        # Hoisted input projection + bias: ONE big matmul per layer; only the
        # tiny h @ W_hh^T remains on the serial timestep dependency chain.
        gx = (jnp.dot(x_in, w_ih_T_ref[...],
                      preferred_element_type=jnp.float32)
              + b_ref[...])                                         # (S*B, 4H)
        gx_buf[...] = gx.reshape(S, B, 4 * H)

        def step(t, carry, w_hh_T=w_hh_T, is_last=is_last):
            h, c = carry
            gates = gx_buf[t] + jnp.dot(h, w_hh_T,
                                        preferred_element_type=jnp.float32)
            i_g = jax.nn.sigmoid(gates[:, 0 * H:1 * H])
            f_g = jax.nn.sigmoid(gates[:, 1 * H:2 * H])
            g_g = jnp.tanh(gates[:, 2 * H:3 * H])
            o_g = jax.nn.sigmoid(gates[:, 3 * H:4 * H])
            c_new = f_g * c + i_g * g_g
            h_new = o_g * jnp.tanh(c_new)
            if is_last:
                out_ref[t] = h_new          # last layer writes output directly
            else:
                y_buf[t] = h_new            # inter-layer handoff
            return (h_new, c_new)

        # S is small & static: fully unroll so the recurrence body is visible
        # to the LLO scheduler (MXU / EUP / store overlap across timesteps).
        h_fin, c_fin = lax.fori_loop(0, S, step, (h0_ref[l], c0_ref[l]),
                                     unroll=True)
        hn_ref[l] = h_fin
        cn_ref[l] = c_fin


def encoder_forward(ids, params, hidden=None):
    """Pallas Encoder forward. ids: (S, B) int32. Returns (out, (h_n, c_n))."""
    table = params["embedding"]                      # (V, E)
    lstm = params["lstm"]
    L = len(lstm)
    V, E = table.shape
    S, B = ids.shape
    H = lstm[0]["w_hh"].shape[1]                     # w_hh: (4H, H)

    if hidden is None:
        h0 = jnp.zeros((L, B, H), jnp.float32)
        c0 = jnp.zeros((L, B, H), jnp.float32)
    else:
        h0, c0 = hidden

    ins = [ids.astype(jnp.int32), table, h0, c0]
    for l in range(L):
        p = lstm[l]
        ins.append(jnp.asarray(p["w_ih"]).T)                         # (in_l, 4H)
        ins.append(jnp.asarray(p["w_hh"]).T)                         # (H, 4H)
        ins.append((p["b_ih"] + p["b_hh"]).reshape(1, 4 * H))        # (1, 4H)

    kernel = functools.partial(_encoder_kernel, S, B, V, E, H, L)

    # TODO(synk): for non-trivial batch sizes on v7x, add a grid over the batch
    # dimension with dimension_semantics=("parallel",) so both TensorCores run
    # half the batch's recurrence; at B=2 the serial recurrence dominates.
    out, hn, cn = pl.pallas_call(
        kernel,
        out_shape=(
            jax.ShapeDtypeStruct((S, B, H), jnp.float32),
            jax.ShapeDtypeStruct((L, B, H), jnp.float32),
            jax.ShapeDtypeStruct((L, B, H), jnp.float32),
        ),
        in_specs=[pl.BlockSpec(memory_space=pltpu.MemorySpace.VMEM)
                  for _ in range(len(ins))],
        out_specs=(pl.BlockSpec(memory_space=pltpu.MemorySpace.VMEM),
                   pl.BlockSpec(memory_space=pltpu.MemorySpace.VMEM),
                   pl.BlockSpec(memory_space=pltpu.MemorySpace.VMEM)),
        scratch_shapes=[
            pltpu.VMEM((S, B, H), jnp.float32),       # inter-layer hidden slab
            pltpu.VMEM((S, B, 4 * H), jnp.float32),   # hoisted input projection
        ],
    )(*ins)
    return out, (hn, cn)


def init_params(key, vocab, embed, hidden, layers):
    """Deterministic init mirroring PyTorch shapes (Embedding ~N(0,1); LSTM U(-k,k))."""
    keys = jax.random.split(key, 1 + 4 * layers)
    k = 1.0 / (hidden ** 0.5)
    params = {"embedding": jax.random.normal(keys[0], (vocab, embed), jnp.float32)}
    lstm = []
    for l in range(layers):
        in_size = embed if l == 0 else hidden
        kw = keys[1 + 4 * l: 1 + 4 * (l + 1)]
        lstm.append({
            "w_ih": jax.random.uniform(kw[0], (4 * hidden, in_size), jnp.float32, -k, k),
            "w_hh": jax.random.uniform(kw[1], (4 * hidden, hidden), jnp.float32, -k, k),
            "b_ih": jax.random.uniform(kw[2], (4 * hidden,), jnp.float32, -k, k),
            "b_hh": jax.random.uniform(kw[3], (4 * hidden,), jnp.float32, -k, k),
        })
    params["lstm"] = lstm
    return params


def encoder_reference(ids, params, hidden=None):
    """Pure-JAX reference matching torch.nn.Embedding + nn.LSTM semantics."""
    table = params["embedding"]
    x = table[ids]                                   # (S, B, E) gather
    lstm = params["lstm"]
    L = len(lstm)
    S, B = ids.shape
    H = lstm[0]["w_hh"].shape[1]
    if hidden is None:
        h0 = jnp.zeros((L, B, H), jnp.float32)
        c0 = jnp.zeros((L, B, H), jnp.float32)
    else:
        h0, c0 = hidden
    hs, cs = [], []
    hi = jax.lax.Precision.HIGHEST
    for l in range(L):
        p = lstm[l]
        h, c = h0[l], c0[l]
        outs = []
        for t in range(S):
            gates = (jnp.dot(x[t], p["w_ih"].T, precision=hi)
                     + jnp.dot(h, p["w_hh"].T, precision=hi)
                     + p["b_ih"] + p["b_hh"])
            i_g, f_g, g_g, o_g = jnp.split(gates, 4, axis=-1)
            i_g, f_g, o_g = jax.nn.sigmoid(i_g), jax.nn.sigmoid(f_g), jax.nn.sigmoid(o_g)
            g_g = jnp.tanh(g_g)
            c = f_g * c + i_g * g_g
            h = o_g * jnp.tanh(c)
            outs.append(h)
        x = jnp.stack(outs, 0)
        hs.append(h)
        cs.append(c)
    return x, (jnp.stack(hs), jnp.stack(cs))


if __name__ == "__main__":
    # Small shapes consistent with the module's forward:
    # vocabulary_size=32, embed_size=16, hidden_size=32, lstm_n_layers=2
    V, E, H, L = 32, 16, 32, 2
    S, B = 8, 2                       # seq_len=8, batch=2

    key = jax.random.PRNGKey(0)
    kp, kid = jax.random.split(key)
    params = init_params(kp, V, E, H, L)
    ids = jax.random.randint(kid, (S, B), 0, V, dtype=jnp.int32)

    out, (hn, cn) = encoder_forward(ids, params)      # hidden=None -> zero init
    jax.block_until_ready((out, hn, cn))

    ref_out, (ref_hn, ref_cn) = encoder_reference(ids, params)
    assert out.shape == (S, B, H) and hn.shape == (L, B, H) and cn.shape == (L, B, H)
    assert jnp.allclose(out, ref_out, atol=1e-4, rtol=1e-4)
    assert jnp.allclose(hn, ref_hn, atol=1e-4, rtol=1e-4)
    assert jnp.allclose(cn, ref_cn, atol=1e-4, rtol=1e-4)

    print("KERNEL_OK")
</pallas_src>

<mosaic_0001>
module attributes {stable_mosaic.version = 11 : i64} {
  func.func @_encoder_kernel(%arg0: memref<8x2xi32, #tpu.memory_space<vmem>>, %arg1: memref<32x16xf32, #tpu.memory_space<vmem>>, %arg2: memref<2x2x32xf32, #tpu.memory_space<vmem>>, %arg3: memref<2x2x32xf32, #tpu.memory_space<vmem>>, %arg4: memref<16x128xf32, #tpu.memory_space<vmem>>, %arg5: memref<32x128xf32, #tpu.memory_space<vmem>>, %arg6: memref<1x128xf32, #tpu.memory_space<vmem>>, %arg7: memref<32x128xf32, #tpu.memory_space<vmem>>, %arg8: memref<32x128xf32, #tpu.memory_space<vmem>>, %arg9: memref<1x128xf32, #tpu.memory_space<vmem>>, %arg10: memref<8x2x32xf32, #tpu.memory_space<vmem>>, %arg11: memref<2x2x32xf32, #tpu.memory_space<vmem>>, %arg12: memref<2x2x32xf32, #tpu.memory_space<vmem>>, %arg13: memref<8x2x32xf32, #tpu.memory_space<vmem>>, %arg14: memref<8x2x128xf32, #tpu.memory_space<vmem>>) attributes {dimension_semantics = [], scalar_prefetch = 0 : i64, scratch_operands = 2 : i64, tpu.core_type = #tpu.core_type<tc>} {
    %c0 = arith.constant 0 : index
    %c0_0 = arith.constant 0 : index
    %0 = vector.load %arg0[%c0, %c0_0] : memref<8x2xi32, #tpu.memory_space<vmem>>, vector<8x2xi32>
    %1 = tpu.iota {dimensions = array<i32: 2>} : vector<8x2x32xi32>
    %2 = vector.shape_cast %0 : vector<8x2xi32> to vector<8x2x1xi32>
    %3 = vector.broadcast %2 : vector<8x2x1xi32> to vector<8x2x32xi32>
    %4 = arith.cmpi eq, %3, %1 : vector<8x2x32xi32>
    %5 = arith.extui %4 : vector<8x2x32xi1> to vector<8x2x32xi32>
    %6 = arith.sitofp %5 : vector<8x2x32xi32> to vector<8x2x32xf32>
    %7 = vector.shape_cast %6 : vector<8x2x32xf32> to vector<16x32xf32>
    %c0_1 = arith.constant 0 : index
    %c0_2 = arith.constant 0 : index
    %8 = vector.load %arg1[%c0_1, %c0_2] : memref<32x16xf32, #tpu.memory_space<vmem>>, vector<32x16xf32>
    %cst = arith.constant dense<0.000000e+00> : vector<16x16xf32>
    %9 = tpu.matmul %7, %8, %cst {dimension_numbers = #tpu.dot_dimension_numbers<[1], [0], [0], [1], [0, 0, 1, 1], [], []>} : vector<16x32xf32>, vector<32x16xf32>, vector<16x16xf32> -> vector<16x16xf32>
    %c0_3 = arith.constant 0 : index
    %c0_4 = arith.constant 0 : index
    %10 = vector.load %arg5[%c0_3, %c0_4] : memref<32x128xf32, #tpu.memory_space<vmem>>, vector<32x128xf32>
    %c0_5 = arith.constant 0 : index
    %c0_6 = arith.constant 0 : index
    %11 = vector.load %arg4[%c0_5, %c0_6] : memref<16x128xf32, #tpu.memory_space<vmem>>, vector<16x128xf32>
    %cst_7 = arith.constant dense<0.000000e+00> : vector<16x128xf32>
    %12 = tpu.matmul %9, %11, %cst_7 {dimension_numbers = #tpu.dot_dimension_numbers<[1], [0], [0], [1], [0, 0, 1, 1], [], []>} : vector<16x16xf32>, vector<16x128xf32>, vector<16x128xf32> -> vector<16x128xf32>
    %c0_8 = arith.constant 0 : index
    %c0_9 = arith.constant 0 : index
    %13 = vector.load %arg6[%c0_8, %c0_9] : memref<1x128xf32, #tpu.memory_space<vmem>>, vector<1x128xf32>
    %14 = vector.broadcast %13 : vector<1x128xf32> to vector<16x128xf32>
    %15 = arith.addf %12, %14 : vector<16x128xf32>
    %16 = vector.shape_cast %15 : vector<16x128xf32> to vector<8x2x128xf32>
    %c0_10 = arith.constant 0 : index
    %c0_11 = arith.constant 0 : index
    %c0_12 = arith.constant 0 : index
    %17 = vector.load %arg14[%c0_10, %c0_11, %c0_12] : memref<8x2x128xf32, #tpu.memory_space<vmem>>, vector<8x2x128xf32>
    tpu.vector_store %arg14[%c0_10, %c0_11, %c0_12], %16 {strides = array<i32>} : memref<8x2x128xf32, #tpu.memory_space<vmem>>, vector<8x2x128xf32>,
    %c0_13 = arith.constant 0 : index
    %c0_14 = arith.constant 0 : index
    %c0_15 = arith.constant 0 : index
    %18 = vector.load %arg2[%c0_13, %c0_14, %c0_15] : memref<2x2x32xf32, #tpu.memory_space<vmem>>, vector<1x2x32xf32>
    %19 = vector.shape_cast %18 : vector<1x2x32xf32> to vector<2x32xf32>
    %c0_16 = arith.constant 0 : index
    %c0_17 = arith.constant 0 : index
    %c0_18 = arith.constant 0 : index
    %20 = vector.load %arg3[%c0_16, %c0_17, %c0_18] : memref<2x2x32xf32, #tpu.memory_space<vmem>>, vector<1x2x32xf32>
    %21 = vector.shape_cast %20 : vector<1x2x32xf32> to vector<2x32xf32>
    %c0_i32 = arith.constant 0 : i32
    %22 = arith.index_cast %c0_i32 : i32 to index
    %c0_19 = arith.constant 0 : index
    %c0_20 = arith.constant 0 : index
    %23 = vector.load %arg14[%22, %c0_19, %c0_20] : memref<8x2x128xf32, #tpu.memory_space<vmem>>, vector<1x2x128xf32>
    %24 = vector.shape_cast %23 : vector<1x2x128xf32> to vector<2x128xf32>
    %cst_21 = arith.constant dense<0.000000e+00> : vector<2x128xf32>
    %25 = tpu.matmul %19, %10, %cst_21 {dimension_numbers = #tpu.dot_dimension_numbers<[1], [0], [0], [1], [0, 0, 1, 1], [], []>} : vector<2x32xf32>, vector<32x128xf32>, vector<2x128xf32> -> vector<2x128xf32>
    %26 = arith.addf %24, %25 : vector<2x128xf32>
    %27 = vector.extract_strided_slice %26 {offsets = [0, 0], sizes = [2, 32], strides = [1, 1]} : vector<2x128xf32> to vector<2x32xf32>
    %28 = arith.negf %27 : vector<2x32xf32>
    %29 = math.exp %28 : vector<2x32xf32>
    %cst_22 = arith.constant 1.000000e+00 : f32
    %30 = vector.broadcast %cst_22 : f32 to vector<2x32xf32>
    %31 = arith.addf %30, %29 : vector<2x32xf32>
    %32 = arith.divf %30, %31 : vector<2x32xf32>
    %33 = vector.extract_strided_slice %26 {offsets = [0, 32], sizes = [2, 32], strides = [1, 1]} : vector<2x128xf32> to vector<2x32xf32>
    %34 = arith.negf %33 : vector<2x32xf32>
    %35 = math.exp %34 : vector<2x32xf32>
    %cst_23 = arith.constant 1.000000e+00 : f32
    %36 = vector.broadcast %cst_23 : f32 to vector<2x32xf32>
    %37 = arith.addf %36, %35 : vector<2x32xf32>
    %38 = arith.divf %36, %37 : vector<2x32xf32>
    %39 = vector.extract_strided_slice %26 {offsets = [0, 64], sizes = [2, 32], strides = [1, 1]} : vector<2x128xf32> to vector<2x32xf32>
    %40 = math.tanh %39 : vector<2x32xf32>
    %41 = vector.extract_strided_slice %26 {offsets = [0, 96], sizes = [2, 32], strides = [1, 1]} : vector<2x128xf32> to vector<2x32xf32>
    %42 = arith.negf %41 : vector<2x32xf32>
    %43 = math.exp %42 : vector<2x32xf32>
    %cst_24 = arith.constant 1.000000e+00 : f32
    %44 = vector.broadcast %cst_24 : f32 to vector<2x32xf32>
    %45 = arith.addf %44, %43 : vector<2x32xf32>
    %46 = arith.divf %44, %45 : vector<2x32xf32>
    %47 = arith.mulf %38, %21 : vector<2x32xf32>
    %48 = arith.mulf %32, %40 : vector<2x32xf32>
    %49 = arith.addf %47, %48 : vector<2x32xf32>
    %50 = math.tanh %49 : vector<2x32xf32>
    %51 = arith.mulf %46, %50 : vector<2x32xf32>
    %52 = arith.index_cast %c0_i32 : i32 to index
    %c0_25 = arith.constant 0 : index
    %c0_26 = arith.constant 0 : index
    %53 = vector.load %arg13[%52, %c0_25, %c0_26] : memref<8x2x32xf32, #tpu.memory_space<vmem>>, vector<1x2x32xf32>
    %54 = vector.shape_cast %53 : vector<1x2x32xf32> to vector<2x32xf32>
    %55 = vector.shape_cast %51 : vector<2x32xf32> to vector<1x2x32xf32>
    tpu.vector_store %arg13[%52, %c0_25, %c0_26], %55 {strides = array<i32>} : memref<8x2x32xf32, #tpu.memory_space<vmem>>, vector<1x2x32xf32>,
    %c1_i32 = arith.constant 1 : i32
    %56 = arith.index_cast %c1_i32 : i32 to index
    %c0_27 = arith.constant 0 : index
    %c0_28 = arith.constant 0 : index
    %57 = vector.load %arg14[%56, %c0_27, %c0_28] : memref<8x2x128xf32, #tpu.memory_space<vmem>>, vector<1x2x128xf32>
    %58 = vector.shape_cast %57 : vector<1x2x128xf32> to vector<2x128xf32>
    %cst_29 = arith.constant dense<0.000000e+00> : vector<2x128xf32>
    %59 = tpu.matmul %51, %10, %cst_29 {dimension_numbers = #tpu.dot_dimension_numbers<[1], [0], [0], [1], [0, 0, 1, 1], [], []>} : vector<2x32xf32>, vector<32x128xf32>, vector<2x128xf32> -> vector<2x128xf32>
    %60 = arith.addf %58, %59 : vector<2x128xf32>
    %61 = vector.extract_strided_slice %60 {offsets = [0, 0], sizes = [2, 32], strides = [1, 1]} : vector<2x128xf32> to vector<2x32xf32>
    %62 = arith.negf %61 : vector<2x32xf32>
    %63 = math.exp %62 : vector<2x32xf32>
    %cst_30 = arith.constant 1.000000e+00 : f32
    %64 = vector.broadcast %cst_30 : f32 to vector<2x32xf32>
    %65 = arith.addf %64, %63 : vector<2x32xf32>
    %66 = arith.divf %64, %65 : vector<2x32xf32>
    %67 = vector.extract_strided_slice %60 {offsets = [0, 32], sizes = [2, 32], strides = [1, 1]} : vector<2x128xf32> to vector<2x32xf32>
    %68 = arith.negf %67 : vector<2x32xf32>
    %69 = math.exp %68 : vector<2x32xf32>
    %cst_31 = arith.constant 1.000000e+00 : f32
    %70 = vector.broadcast %cst_31 : f32 to vector<2x32xf32>
    %71 = arith.addf %70, %69 : vector<2x32xf32>
    %72 = arith.divf %70, %71 : vector<2x32xf32>
    %73 = vector.extract_strided_slice %60 {offsets = [0, 64], sizes = [2, 32], strides = [1, 1]} : vector<2x128xf32> to vector<2x32xf32>
    %74 = math.tanh %73 : vector<2x32xf32>
    %75 = vector.extract_strided_slice %60 {offsets = [0, 96], sizes = [2, 32], strides = [1, 1]} : vector<2x128xf32> to vector<2x32xf32>
    %76 = arith.negf %75 : vector<2x32xf32>
    %77 = math.exp %76 : vector<2x32xf32>
    %cst_32 = arith.constant 1.000000e+00 : f32
    %78 = vector.broadcast %cst_32 : f32 to vector<2x32xf32>
    %79 = arith.addf %78, %77 : vector<2x32xf32>
    %80 = arith.divf %78, %79 : vector<2x32xf32>
    %81 = arith.mulf %72, %49 : vector<2x32xf32>
    %82 = arith.mulf %66, %74 : vector<2x32xf32>
    %83 = arith.addf %81, %82 : vector<2x32xf32>
    %84 = math.tanh %83 : vector<2x32xf32>
    %85 = arith.mulf %80, %84 : vector<2x32xf32>
    %86 = arith.index_cast %c1_i32 : i32 to index
    %c0_33 = arith.constant 0 : index
    %c0_34 = arith.constant 0 : index
    %87 = vector.load %arg13[%86, %c0_33, %c0_34] : memref<8x2x32xf32, #tpu.memory_space<vmem>>, vector<1x2x32xf32>
    %88 = vector.shape_cast %87 : vector<1x2x32xf32> to vector<2x32xf32>
    %89 = vector.shape_cast %85 : vector<2x32xf32> to vector<1x2x32xf32>
    tpu.vector_store %arg13[%86, %c0_33, %c0_34], %89 {strides = array<i32>} : memref<8x2x32xf32, #tpu.memory_space<vmem>>, vector<1x2x32xf32>,
    %c2_i32 = arith.constant 2 : i32
    %90 = arith.index_cast %c2_i32 : i32 to index
    %c0_35 = arith.constant 0 : index
    %c0_36 = arith.constant 0 : index
    %91 = vector.load %arg14[%90, %c0_35, %c0_36] : memref<8x2x128xf32, #tpu.memory_space<vmem>>, vector<1x2x128xf32>
    %92 = vector.shape_cast %91 : vector<1x2x128xf32> to vector<2x128xf32>
    %cst_37 = arith.constant dense<0.000000e+00> : vector<2x128xf32>
    %93 = tpu.matmul %85, %10, %cst_37 {dimension_numbers = #tpu.dot_dimension_numbers<[1], [0], [0], [1], [0, 0, 1, 1], [], []>} : vector<2x32xf32>, vector<32x128xf32>, vector<2x128xf32> -> vector<2x128xf32>
    %94 = arith.addf %92, %93 : vector<2x128xf32>
    %95 = vector.extract_strided_slice %94 {offsets = [0, 0], sizes = [2, 32], strides = [1, 1]} : vector<2x128xf32> to vector<2x32xf32>
    %96 = arith.negf %95 : vector<2x32xf32>
    %97 = math.exp %96 : vector<2x32xf32>
    %cst_38 = arith.constant 1.000000e+00 : f32
    %98 = vector.broadcast %cst_38 : f32 to vector<2x32xf32>
    %99 = arith.addf %98, %97 : vector<2x32xf32>
    %100 = arith.divf %98, %99 : vector<2x32xf32>
    %101 = vector.extract_strided_slice %94 {offsets = [0, 32], sizes = [2, 32], strides = [1, 1]} : vector<2x128xf32> to vector<2x32xf32>
    %102 = arith.negf %101 : vector<2x32xf32>
    %103 = math.exp %102 : vector<2x32xf32>
    %cst_39 = arith.constant 1.000000e+00 : f32
    %104 = vector.broadcast %cst_39 : f32 to vector<2x32xf32>
    %105 = arith.addf %104, %103 : vector<2x32xf32>
    %106 = arith.divf %104, %105 : vector<2x32xf32>
    %107 = vector.extract_strided_slice %94 {offsets = [0, 64], sizes = [2, 32], strides = [1, 1]} : vector<2x128xf32> to vector<2x32xf32>
    %108 = math.tanh %107 : vector<2x32xf32>
    %109 = vector.extract_strided_slice %94 {offsets = [0, 96], sizes = [2, 32], strides = [1, 1]} : vector<2x128xf32> to vector<2x32xf32>
    %110 = arith.negf %109 : vector<2x32xf32>
    %111 = math.exp %110 : vector<2x32xf32>
    %cst_40 = arith.constant 1.000000e+00 : f32
    %112 = vector.broadcast %cst_40 : f32 to vector<2x32xf32>
    %113 = arith.addf %112, %111 : vector<2x32xf32>
    %114 = arith.divf %112, %113 : vector<2x32xf32>
    %115 = arith.mulf %106, %83 : vector<2x32xf32>
    %116 = arith.mulf %100, %108 : vector<2x32xf32>
    %117 = arith.addf %115, %116 : vector<2x32xf32>
    %118 = math.tanh %117 : vector<2x32xf32>
    %119 = arith.mulf %114, %118 : vector<2x32xf32>
    %120 = arith.index_cast %c2_i32 : i32 to index
    %c0_41 = arith.constant 0 : index
    %c0_42 = arith.constant 0 : index
    %121 = vector.load %arg13[%120, %c0_41, %c0_42] : memref<8x2x32xf32, #tpu.memory_space<vmem>>, vector<1x2x32xf32>
    %122 = vector.shape_cast %121 : vector<1x2x32xf32> to vector<2x32xf32>
    %123 = vector.shape_cast %119 : vector<2x32xf32> to vector<1x2x32xf32>
    tpu.vector_store %arg13[%120, %c0_41, %c0_42], %123 {strides = array<i32>} : memref<8x2x32xf32, #tpu.memory_space<vmem>>, vector<1x2x32xf32>,
    %c3_i32 = arith.constant 3 : i32
    %124 = arith.index_cast %c3_i32 : i32 to index
    %c0_43 = arith.constant 0 : index
    %c0_44 = arith.constant 0 : index
    %125 = vector.load %arg14[%124, %c0_43, %c0_44] : memref<8x2x128xf32, #tpu.memory_space<vmem>>, vector<1x2x128xf32>
    %126 = vector.shape_cast %125 : vector<1x2x128xf32> to vector<2x128xf32>
    %cst_45 = arith.constant dense<0.000000e+00> : vector<2x128xf32>
    %127 = tpu.matmul %119, %10, %cst_45 {dimension_numbers = #tpu.dot_dimension_numbers<[1], [0], [0], [1], [0, 0, 1, 1], [], []>} : vector<2x32xf32>, vector<32x128xf32>, vector<2x128xf32> -> vector<2x128xf32>
    %128 = arith.addf %126, %127 : vector<2x128xf32>
    %129 = vector.extract_strided_slice %128 {offsets = [0, 0], sizes = [2, 32], strides = [1, 1]} : vector<2x128xf32> to vector<2x32xf32>
    %130 = arith.negf %129 : vector<2x32xf32>
    %131 = math.exp %130 : vector<2x32xf32>
    %cst_46 = arith.constant 1.000000e+00 : f32
    %132 = vector.broadcast %cst_46 : f32 to vector<2x32xf32>
    %133 = arith.addf %132, %131 : vector<2x32xf32>
    %134 = arith.divf %132, %133 : vector<2x32xf32>
    %135 = vector.extract_strided_slice %128 {offsets = [0, 32], sizes = [2, 32], strides = [1, 1]} : vector<2x128xf32> to vector<2x32xf32>
    %136 = arith.negf %135 : vector<2x32xf32>
    %137 = math.exp %136 : vector<2x32xf32>
    %cst_47 = arith.constant 1.000000e+00 : f32
    %138 = vector.broadcast %cst_47 : f32 to vector<2x32xf32>
    %139 = arith.addf %138, %137 : vector<2x32xf32>
    %140 = arith.divf %138, %139 : vector<2x32xf32>
    %141 = vector.extract_strided_slice %128 {offsets = [0, 64], sizes = [2, 32], strides = [1, 1]} : vector<2x128xf32> to vector<2x32xf32>
    %142 = math.tanh %141 : vector<2x32xf32>
    %143 = vector.extract_strided_slice %128 {offsets = [0, 96], sizes = [2, 32], strides = [1, 1]} : vector<2x128xf32> to vector<2x32xf32>
    %144 = arith.negf %143 : vector<2x32xf32>
    %145 = math.exp %144 : vector<2x32xf32>
    %cst_48 = arith.constant 1.000000e+00 : f32
    %146 = vector.broadcast %cst_48 : f32 to vector<2x32xf32>
    %147 = arith.addf %146, %145 : vector<2x32xf32>
    %148 = arith.divf %146, %147 : vector<2x32xf32>
    %149 = arith.mulf %140, %117 : vector<2x32xf32>
    %150 = arith.mulf %134, %142 : vector<2x32xf32>
    %151 = arith.addf %149, %150 : vector<2x32xf32>
    %152 = math.tanh %151 : vector<2x32xf32>
    %153 = arith.mulf %148, %152 : vector<2x32xf32>
    %154 = arith.index_cast %c3_i32 : i32 to index
    %c0_49 = arith.constant 0 : index
    %c0_50 = arith.constant 0 : index
    %155 = vector.load %arg13[%154, %c0_49, %c0_50] : memref<8x2x32xf32, #tpu.memory_space<vmem>>, vector<1x2x32xf32>
    %156 = vector.shape_cast %155 : vector<1x2x32xf32> to vector<2x32xf32>
    %157 = vector.shape_cast %153 : vector<2x32xf32> to vector<1x2x32xf32>
    tpu.vector_store %arg13[%154, %c0_49, %c0_50], %157 {strides = array<i32>} : memref<8x2x32xf32, #tpu.memory_space<vmem>>, vector<1x2x32xf32>,
    %c4_i32 = arith.constant 4 : i32
    %158 = arith.index_cast %c4_i32 : i32 to index
    %c0_51 = arith.constant 0 : index
    %c0_52 = arith.constant 0 : index
    %159 = vector.load %arg14[%158, %c0_51, %c0_52] : memref<8x2x128xf32, #tpu.memory_space<vmem>>, vector<1x2x128xf32>
    %160 = vector.shape_cast %159 : vector<1x2x128xf32> to vector<2x128xf32>
    %cst_53 = arith.constant dense<0.000000e+00> : vector<2x128xf32>
    %161 = tpu.matmul %153, %10, %cst_53 {dimension_numbers = #tpu.dot_dimension_numbers<[1], [0], [0], [1], [0, 0, 1, 1], [], []>} : vector<2x32xf32>, vector<32x128xf32>, vector<2x128xf32> -> vector<2x128xf32>
    %162 = arith.addf %160, %161 : vector<2x128xf32>
    %163 = vector.extract_strided_slice %162 {offsets = [0, 0], sizes = [2, 32], strides = [1, 1]} : vector<2x128xf32> to vector<2x32xf32>
    %164 = arith.negf %163 : vector<2x32xf32>
    %165 = math.exp %164 : vector<2x32xf32>
    %cst_54 = arith.constant 1.000000e+00 : f32
    %166 = vector.broadcast %cst_54 : f32 to vector<2x32xf32>
    %167 = arith.addf %166, %165 : vector<2x32xf32>
    %168 = arith.divf %166, %167 : vector<2x32xf32>
    %169 = vector.extract_strided_slice %162 {offsets = [0, 32], sizes = [2, 32], strides = [1, 1]} : vector<2x128xf32> to vector<2x32xf32>
    %170 = arith.negf %169 : vector<2x32xf32>
    %171 = math.exp %170 : vector<2x32xf32>
    %cst_55 = arith.constant 1.000000e+00 : f32
    %172 = vector.broadcast %cst_55 : f32 to vector<2x32xf32>
    %173 = arith.addf %172, %171 : vector<2x32xf32>
    %174 = arith.divf %172, %173 : vector<2x32xf32>
    %175 = vector.extract_strided_slice %162 {offsets = [0, 64], sizes = [2, 32], strides = [1, 1]} : vector<2x128xf32> to vector<2x32xf32>
    %176 = math.tanh %175 : vector<2x32xf32>
    %177 = vector.extract_strided_slice %162 {offsets = [0, 96], sizes = [2, 32], strides = [1, 1]} : vector<2x128xf32> to vector<2x32xf32>
    %178 = arith.negf %177 : vector<2x32xf32>
    %179 = math.exp %178 : vector<2x32xf32>
    %cst_56 = arith.constant 1.000000e+00 : f32
    %180 = vector.broadcast %cst_56 : f32 to vector<2x32xf32>
    %181 = arith.addf %180, %179 : vector<2x32xf32>
    %182 = arith.divf %180, %181 : vector<2x32xf32>
    %183 = arith.mulf %174, %151 : vector<2x32xf32>
    %184 = arith.mulf %168, %176 : vector<2x32xf32>
    %185 = arith.addf %183, %184 : vector<2x32xf32>
    %186 = math.tanh %185 : vector<2x32xf32>
    %187 = arith.mulf %182, %186 : vector<2x32xf32>
    %188 = arith.index_cast %c4_i32 : i32 to index
    %c0_57 = arith.constant 0 : index
    %c0_58 = arith.constant 0 : index
    %189 = vector.load %arg13[%188, %c0_57, %c0_58] : memref<8x2x32xf32, #tpu.memory_space<vmem>>, vector<1x2x32xf32>
    %190 = vector.shape_cast %189 : vector<1x2x32xf32> to vector<2x32xf32>
    %191 = vector.shape_cast %187 : vector<2x32xf32> to vector<1x2x32xf32>
    tpu.vector_store %arg13[%188, %c0_57, %c0_58], %191 {strides = array<i32>} : memref<8x2x32xf32, #tpu.memory_space<vmem>>, vector<1x2x32xf32>,
    %c5_i32 = arith.constant 5 : i32
    %192 = arith.index_cast %c5_i32 : i32 to index
    %c0_59 = arith.constant 0 : index
    %c0_60 = arith.constant 0 : index
    %193 = vector.load %arg14[%192, %c0_59, %c0_60] : memref<8x2x128xf32, #tpu.memory_space<vmem>>, vector<1x2x128xf32>
    %194 = vector.shape_cast %193 : vector<1x2x128xf32> to vector<2x128xf32>
    %cst_61 = arith.constant dense<0.000000e+00> : vector<2x128xf32>
    %195 = tpu.matmul %187, %10, %cst_61 {dimension_numbers = #tpu.dot_dimension_numbers<[1], [0], [0], [1], [0, 0, 1, 1], [], []>} : vector<2x32xf32>, vector<32x128xf32>, vector<2x128xf32> -> vector<2x128xf32>
    %196 = arith.addf %194, %195 : vector<2x128xf32>
    %197 = vector.extract_strided_slice %196 {offsets = [0, 0], sizes = [2, 32], strides = [1, 1]} : vector<2x128xf32> to vector<2x32xf32>
    %198 = arith.negf %197 : vector<2x32xf32>
    %199 = math.exp %198 : vector<2x32xf32>
    %cst_62 = arith.constant 1.000000e+00 : f32
    %200 = vector.broadcast %cst_62 : f32 to vector<2x32xf32>
    %201 = arith.addf %200, %199 : vector<2x32xf32>
    %202 = arith.divf %200, %201 : vector<2x32xf32>
    %203 = vector.extract_strided_slice %196 {offsets = [0, 32], sizes = [2, 32], strides = [1, 1]} : vector<2x128xf32> to vector<2x32xf32>
    %204 = arith.negf %203 : vector<2x32xf32>
    %205 = math.exp %204 : vector<2x32xf32>
    %cst_63 = arith.constant 1.000000e+00 : f32
    %206 = vector.broadcast %cst_63 : f32 to vector<2x32xf32>
    %207 = arith.addf %206, %205 : vector<2x32xf32>
    %208 = arith.divf %206, %207 : vector<2x32xf32>
    %209 = vector.extract_strided_slice %196 {offsets = [0, 64], sizes = [2, 32], strides = [1, 1]} : vector<2x128xf32> to vector<2x32xf32>
    %210 = math.tanh %209 : vector<2x32xf32>
    %211 = vector.extract_strided_slice %196 {offsets = [0, 96], sizes = [2, 32], strides = [1, 1]} : vector<2x128xf32> to vector<2x32xf32>
    %212 = arith.negf %211 : vector<2x32xf32>
    %213 = math.exp %212 : vector<2x32xf32>
    %cst_64 = arith.constant 1.000000e+00 : f32
    %214 = vector.broadcast %cst_64 : f32 to vector<2x32xf32>
    %215 = arith.addf %214, %213 : vector<2x32xf32>
    %216 = arith.divf %214, %215 : vector<2x32xf32>
    %217 = arith.mulf %208, %185 : vector<2x32xf32>
    %218 = arith.mulf %202, %210 : vector<2x32xf32>
    %219 = arith.addf %217, %218 : vector<2x32xf32>
    %220 = math.tanh %219 : vector<2x32xf32>
    %221 = arith.mulf %216, %220 : vector<2x32xf32>
    %222 = arith.index_cast %c5_i32 : i32 to index
    %c0_65 = arith.constant 0 : index
    %c0_66 = arith.constant 0 : index
    %223 = vector.load %arg13[%222, %c0_65, %c0_66] : memref<8x2x32xf32, #tpu.memory_space<vmem>>, vector<1x2x32xf32>
    %224 = vector.shape_cast %223 : vector<1x2x32xf32> to vector<2x32xf32>
    %225 = vector.shape_cast %221 : vector<2x32xf32> to vector<1x2x32xf32>
    tpu.vector_store %arg13[%222, %c0_65, %c0_66], %225 {strides = array<i32>} : memref<8x2x32xf32, #tpu.memory_space<vmem>>, vector<1x2x32xf32>,
    %c6_i32 = arith.constant 6 : i32
    %226 = arith.index_cast %c6_i32 : i32 to index
    %c0_67 = arith.constant 0 : index
    %c0_68 = arith.constant 0 : index
    %227 = vector.load %arg14[%226, %c0_67, %c0_68] : memref<8x2x128xf32, #tpu.memory_space<vmem>>, vector<1x2x128xf32>
    %228 = vector.shape_cast %227 : vector<1x2x128xf32> to vector<2x128xf32>
    %cst_69 = arith.constant dense<0.000000e+00> : vector<2x128xf32>
    %229 = tpu.matmul %221, %10, %cst_69 {dimension_numbers = #tpu.dot_dimension_numbers<[1], [0], [0], [1], [0, 0, 1, 1], [], []>} : vector<2x32xf32>, vector<32x128xf32>, vector<2x128xf32> -> vector<2x128xf32>
    %230 = arith.addf %228, %229 : vector<2x128xf32>
    %231 = vector.extract_strided_slice %230 {offsets = [0, 0], sizes = [2, 32], strides = [1, 1]} : vector<2x128xf32> to vector<2x32xf32>
    %232 = arith.negf %231 : vector<2x32xf32>
    %233 = math.exp %232 : vector<2x32xf32>
    %cst_70 = arith.constant 1.000000e+00 : f32
    %234 = vector.broadcast %cst_70 : f32 to vector<2x32xf32>
    %235 = arith.addf %234, %233 : vector<2x32xf32>
    %236 = arith.divf %234, %235 : vector<2x32xf32>
    %237 = vector.extract_strided_slice %230 {offsets = [0, 32], sizes = [2, 32], strides = [1, 1]} : vector<2x128xf32> to vector<2x32xf32>
    %238 = arith.negf %237 : vector<2x32xf32>
    %239 = math.exp %238 : vector<2x32xf32>
    %cst_71 = arith.constant 1.000000e+00 : f32
    %240 = vector.broadcast %cst_71 : f32 to vector<2x32xf32>
    %241 = arith.addf %240, %239 : vector<2x32xf32>
    %242 = arith.divf %240, %241 : vector<2x32xf32>
    %243 = vector.extract_strided_slice %230 {offsets = [0, 64], sizes = [2, 32], strides = [1, 1]} : vector<2x128xf32> to vector<2x32xf32>
    %244 = math.tanh %243 : vector<2x32xf32>
    %245 = vector.extract_strided_slice %230 {offsets = [0, 96], sizes = [2, 32], strides = [1, 1]} : vector<2x128xf32> to vector<2x32xf32>
    %246 = arith.negf %245 : vector<2x32xf32>
    %247 = math.exp %246 : vector<2x32xf32>
    %cst_72 = arith.constant 1.000000e+00 : f32
    %248 = vector.broadcast %cst_72 : f32 to vector<2x32xf32>
    %249 = arith.addf %248, %247 : vector<2x32xf32>
    %250 = arith.divf %248, %249 : vector<2x32xf32>
    %251 = arith.mulf %242, %219 : vector<2x32xf32>
    %252 = arith.mulf %236, %244 : vector<2x32xf32>
    %253 = arith.addf %251, %252 : vector<2x32xf32>
    %254 = math.tanh %253 : vector<2x32xf32>
    %255 = arith.mulf %250, %254 : vector<2x32xf32>
    %256 = arith.index_cast %c6_i32 : i32 to index
    %c0_73 = arith.constant 0 : index
    %c0_74 = arith.constant 0 : index
    %257 = vector.load %arg13[%256, %c0_73, %c0_74] : memref<8x2x32xf32, #tpu.memory_space<vmem>>, vector<1x2x32xf32>
    %258 = vector.shape_cast %257 : vector<1x2x32xf32> to vector<2x32xf32>
    %259 = vector.shape_cast %255 : vector<2x32xf32> to vector<1x2x32xf32>
    tpu.vector_store %arg13[%256, %c0_73, %c0_74], %259 {strides = array<i32>} : memref<8x2x32xf32, #tpu.memory_space<vmem>>, vector<1x2x32xf32>,
    %c7_i32 = arith.constant 7 : i32
    %260 = arith.index_cast %c7_i32 : i32 to index
    %c0_75 = arith.constant 0 : index
    %c0_76 = arith.constant 0 : index
    %261 = vector.load %arg14[%260, %c0_75, %c0_76] : memref<8x2x128xf32, #tpu.memory_space<vmem>>, vector<1x2x128xf32>
    %262 = vector.shape_cast %261 : vector<1x2x128xf32> to vector<2x128xf32>
    %cst_77 = arith.constant dense<0.000000e+00> : vector<2x128xf32>
    %263 = tpu.matmul %255, %10, %cst_77 {dimension_numbers = #tpu.dot_dimension_numbers<[1], [0], [0], [1], [0, 0, 1, 1], [], []>} : vector<2x32xf32>, vector<32x128xf32>, vector<2x128xf32> -> vector<2x128xf32>
    %264 = arith.addf %262, %263 : vector<2x128xf32>
    %265 = vector.extract_strided_slice %264 {offsets = [0, 0], sizes = [2, 32], strides = [1, 1]} : vector<2x128xf32> to vector<2x32xf32>
    %266 = arith.negf %265 : vector<2x32xf32>
    %267 = math.exp %266 : vector<2x32xf32>
    %cst_78 = arith.constant 1.000000e+00 : f32
    %268 = vector.broadcast %cst_78 : f32 to vector<2x32xf32>
    %269 = arith.addf %268, %267 : vector<2x32xf32>
    %270 = arith.divf %268, %269 : vector<2x32xf32>
    %271 = vector.extract_strided_slice %264 {offsets = [0, 32], sizes = [2, 32], strides = [1, 1]} : vector<2x128xf32> to vector<2x32xf32>
    %272 = arith.negf %271 : vector<2x32xf32>
    %273 = math.exp %272 : vector<2x32xf32>
    %cst_79 = arith.constant 1.000000e+00 : f32
    %274 = vector.broadcast %cst_79 : f32 to vector<2x32xf32>
    %275 = arith.addf %274, %273 : vector<2x32xf32>
    %276 = arith.divf %274, %275 : vector<2x32xf32>
    %277 = vector.extract_strided_slice %264 {offsets = [0, 64], sizes = [2, 32], strides = [1, 1]} : vector<2x128xf32> to vector<2x32xf32>
    %278 = math.tanh %277 : vector<2x32xf32>
    %279 = vector.extract_strided_slice %264 {offsets = [0, 96], sizes = [2, 32], strides = [1, 1]} : vector<2x128xf32> to vector<2x32xf32>
    %280 = arith.negf %279 : vector<2x32xf32>
    %281 = math.exp %280 : vector<2x32xf32>
    %cst_80 = arith.constant 1.000000e+00 : f32
    %282 = vector.broadcast %cst_80 : f32 to vector<2x32xf32>
    %283 = arith.addf %282, %281 : vector<2x32xf32>
    %284 = arith.divf %282, %283 : vector<2x32xf32>
    %285 = arith.mulf %276, %253 : vector<2x32xf32>
    %286 = arith.mulf %270, %278 : vector<2x32xf32>
    %287 = arith.addf %285, %286 : vector<2x32xf32>
    %288 = math.tanh %287 : vector<2x32xf32>
    %289 = arith.mulf %284, %288 : vector<2x32xf32>
    %290 = arith.index_cast %c7_i32 : i32 to index
    %c0_81 = arith.constant 0 : index
    %c0_82 = arith.constant 0 : index
    %291 = vector.load %arg13[%290, %c0_81, %c0_82] : memref<8x2x32xf32, #tpu.memory_space<vmem>>, vector<1x2x32xf32>
    %292 = vector.shape_cast %291 : vector<1x2x32xf32> to vector<2x32xf32>
    %293 = vector.shape_cast %289 : vector<2x32xf32> to vector<1x2x32xf32>
    tpu.vector_store %arg13[%290, %c0_81, %c0_82], %293 {strides = array<i32>} : memref<8x2x32xf32, #tpu.memory_space<vmem>>, vector<1x2x32xf32>,
    %c8_i32 = arith.constant 8 : i32
    %c0_83 = arith.constant 0 : index
    %c0_84 = arith.constant 0 : index
    %c0_85 = arith.constant 0 : index
    %294 = vector.load %arg11[%c0_83, %c0_84, %c0_85] : memref<2x2x32xf32, #tpu.memory_space<vmem>>, vector<1x2x32xf32>
    %295 = vector.shape_cast %294 : vector<1x2x32xf32> to vector<2x32xf32>
    %296 = vector.shape_cast %289 : vector<2x32xf32> to vector<1x2x32xf32>
    tpu.vector_store %arg11[%c0_83, %c0_84, %c0_85], %296 {strides = array<i32>} : memref<2x2x32xf32, #tpu.memory_space<vmem>>, vector<1x2x32xf32>,
    %c0_86 = arith.constant 0 : index
    %c0_87 = arith.constant 0 : index
    %c0_88 = arith.constant 0 : index
    %297 = vector.load %arg12[%c0_86, %c0_87, %c0_88] : memref<2x2x32xf32, #tpu.memory_space<vmem>>, vector<1x2x32xf32>
    %298 = vector.shape_cast %297 : vector<1x2x32xf32> to vector<2x32xf32>
    %299 = vector.shape_cast %287 : vector<2x32xf32> to vector<1x2x32xf32>
    tpu.vector_store %arg12[%c0_86, %c0_87, %c0_88], %299 {strides = array<i32>} : memref<2x2x32xf32, #tpu.memory_space<vmem>>, vector<1x2x32xf32>,
    %c0_89 = arith.constant 0 : index
    %c0_90 = arith.constant 0 : index
    %300 = vector.load %arg8[%c0_89, %c0_90] : memref<32x128xf32, #tpu.memory_space<vmem>>, vector<32x128xf32>
    %c0_91 = arith.constant 0 : index
    %c0_92 = arith.constant 0 : index
    %c0_93 = arith.constant 0 : index
    %301 = vector.load %arg13[%c0_91, %c0_92, %c0_93] : memref<8x2x32xf32, #tpu.memory_space<vmem>>, vector<8x2x32xf32>
    %302 = vector.shape_cast %301 : vector<8x2x32xf32> to vector<16x32xf32>
    %c0_94 = arith.constant 0 : index
    %c0_95 = arith.constant 0 : index
    %303 = vector.load %arg7[%c0_94, %c0_95] : memref<32x128xf32, #tpu.memory_space<vmem>>, vector<32x128xf32>
    %cst_96 = arith.constant dense<0.000000e+00> : vector<16x128xf32>
    %304 = tpu.matmul %302, %303, %cst_96 {dimension_numbers = #tpu.dot_dimension_numbers<[1], [0], [0], [1], [0, 0, 1, 1], [], []>} : vector<16x32xf32>, vector<32x128xf32>, vector<16x128xf32> -> vector<16x128xf32>
    %c0_97 = arith.constant 0 : index
    %c0_98 = arith.constant 0 : index
    %305 = vector.load %arg9[%c0_97, %c0_98] : memref<1x128xf32, #tpu.memory_space<vmem>>, vector<1x128xf32>
    %306 = vector.broadcast %305 : vector<1x128xf32> to vector<16x128xf32>
    %307 = arith.addf %304, %306 : vector<16x128xf32>
    %308 = vector.shape_cast %307 : vector<16x128xf32> to vector<8x2x128xf32>
    %c0_99 = arith.constant 0 : index
    %c0_100 = arith.constant 0 : index
    %c0_101 = arith.constant 0 : index
    %309 = vector.load %arg14[%c0_99, %c0_100, %c0_101] : memref<8x2x128xf32, #tpu.memory_space<vmem>>, vector<8x2x128xf32>
    tpu.vector_store %arg14[%c0_99, %c0_100, %c0_101], %308 {strides = array<i32>} : memref<8x2x128xf32, #tpu.memory_space<vmem>>, vector<8x2x128xf32>,
    %c1 = arith.constant 1 : index
    %c0_102 = arith.constant 0 : index
    %c0_103 = arith.constant 0 : index
    %310 = vector.load %arg2[%c1, %c0_102, %c0_103] : memref<2x2x32xf32, #tpu.memory_space<vmem>>, vector<1x2x32xf32>
    %311 = vector.shape_cast %310 : vector<1x2x32xf32> to vector<2x32xf32>
    %c1_104 = arith.constant 1 : index
    %c0_105 = arith.constant 0 : index
    %c0_106 = arith.constant 0 : index
    %312 = vector.load %arg3[%c1_104, %c0_105, %c0_106] : memref<2x2x32xf32, #tpu.memory_space<vmem>>, vector<1x2x32xf32>
    %313 = vector.shape_cast %312 : vector<1x2x32xf32> to vector<2x32xf32>
    %c0_i32_107 = arith.constant 0 : i32
    %314 = arith.index_cast %c0_i32_107 : i32 to index
    %c0_108 = arith.constant 0 : index
    %c0_109 = arith.constant 0 : index
    %315 = vector.load %arg14[%314, %c0_108, %c0_109] : memref<8x2x128xf32, #tpu.memory_space<vmem>>, vector<1x2x128xf32>
    %316 = vector.shape_cast %315 : vector<1x2x128xf32> to vector<2x128xf32>
    %cst_110 = arith.constant dense<0.000000e+00> : vector<2x128xf32>
    %317 = tpu.matmul %311, %300, %cst_110 {dimension_numbers = #tpu.dot_dimension_numbers<[1], [0], [0], [1], [0, 0, 1, 1], [], []>} : vector<2x32xf32>, vector<32x128xf32>, vector<2x128xf32> -> vector<2x128xf32>
    %318 = arith.addf %316, %317 : vector<2x128xf32>
    %319 = vector.extract_strided_slice %318 {offsets = [0, 0], sizes = [2, 32], strides = [1, 1]} : vector<2x128xf32> to vector<2x32xf32>
    %320 = arith.negf %319 : vector<2x32xf32>
    %321 = math.exp %320 : vector<2x32xf32>
    %cst_111 = arith.constant 1.000000e+00 : f32
    %322 = vector.broadcast %cst_111 : f32 to vector<2x32xf32>
    %323 = arith.addf %322, %321 : vector<2x32xf32>
    %324 = arith.divf %322, %323 : vector<2x32xf32>
    %325 = vector.extract_strided_slice %318 {offsets = [0, 32], sizes = [2, 32], strides = [1, 1]} : vector<2x128xf32> to vector<2x32xf32>
    %326 = arith.negf %325 : vector<2x32xf32>
    %327 = math.exp %326 : vector<2x32xf32>
    %cst_112 = arith.constant 1.000000e+00 : f32
    %328 = vector.broadcast %cst_112 : f32 to vector<2x32xf32>
    %329 = arith.addf %328, %327 : vector<2x32xf32>
    %330 = arith.divf %328, %329 : vector<2x32xf32>
    %331 = vector.extract_strided_slice %318 {offsets = [0, 64], sizes = [2, 32], strides = [1, 1]} : vector<2x128xf32> to vector<2x32xf32>
    %332 = math.tanh %331 : vector<2x32xf32>
    %333 = vector.extract_strided_slice %318 {offsets = [0, 96], sizes = [2, 32], strides = [1, 1]} : vector<2x128xf32> to vector<2x32xf32>
    %334 = arith.negf %333 : vector<2x32xf32>
    %335 = math.exp %334 : vector<2x32xf32>
    %cst_113 = arith.constant 1.000000e+00 : f32
    %336 = vector.broadcast %cst_113 : f32 to vector<2x32xf32>
    %337 = arith.addf %336, %335 : vector<2x32xf32>
    %338 = arith.divf %336, %337 : vector<2x32xf32>
    %339 = arith.mulf %330, %313 : vector<2x32xf32>
    %340 = arith.mulf %324, %332 : vector<2x32xf32>
    %341 = arith.addf %339, %340 : vector<2x32xf32>
    %342 = math.tanh %341 : vector<2x32xf32>
    %343 = arith.mulf %338, %342 : vector<2x32xf32>
    %344 = arith.index_cast %c0_i32_107 : i32 to index
    %c0_114 = arith.constant 0 : index
    %c0_115 = arith.constant 0 : index
    %345 = vector.load %arg10[%344, %c0_114, %c0_115] : memref<8x2x32xf32, #tpu.memory_space<vmem>>, vector<1x2x32xf32>
    %346 = vector.shape_cast %345 : vector<1x2x32xf32> to vector<2x32xf32>
    %347 = vector.shape_cast %343 : vector<2x32xf32> to vector<1x2x32xf32>
    tpu.vector_store %arg10[%344, %c0_114, %c0_115], %347 {strides = array<i32>} : memref<8x2x32xf32, #tpu.memory_space<vmem>>, vector<1x2x32xf32>,
    %c1_i32_116 = arith.constant 1 : i32
    %348 = arith.index_cast %c1_i32_116 : i32 to index
    %c0_117 = arith.constant 0 : index
    %c0_118 = arith.constant 0 : index
    %349 = vector.load %arg14[%348, %c0_117, %c0_118] : memref<8x2x128xf32, #tpu.memory_space<vmem>>, vector<1x2x128xf32>
    %350 = vector.shape_cast %349 : vector<1x2x128xf32> to vector<2x128xf32>
    %cst_119 = arith.constant dense<0.000000e+00> : vector<2x128xf32>
    %351 = tpu.matmul %343, %300, %cst_119 {dimension_numbers = #tpu.dot_dimension_numbers<[1], [0], [0], [1], [0, 0, 1, 1], [], []>} : vector<2x32xf32>, vector<32x128xf32>, vector<2x128xf32> -> vector<2x128xf32>
    %352 = arith.addf %350, %351 : vector<2x128xf32>
    %353 = vector.extract_strided_slice %352 {offsets = [0, 0], sizes = [2, 32], strides = [1, 1]} : vector<2x128xf32> to vector<2x32xf32>
    %354 = arith.negf %353 : vector<2x32xf32>
    %355 = math.exp %354 : vector<2x32xf32>
    %cst_120 = arith.constant 1.000000e+00 : f32
    %356 = vector.broadcast %cst_120 : f32 to vector<2x32xf32>
    %357 = arith.addf %356, %355 : vector<2x32xf32>
    %358 = arith.divf %356, %357 : vector<2x32xf32>
    %359 = vector.extract_strided_slice %352 {offsets = [0, 32], sizes = [2, 32], strides = [1, 1]} : vector<2x128xf32> to vector<2x32xf32>
    %360 = arith.negf %359 : vector<2x32xf32>
    %361 = math.exp %360 : vector<2x32xf32>
    %cst_121 = arith.constant 1.000000e+00 : f32
    %362 = vector.broadcast %cst_121 : f32 to vector<2x32xf32>
    %363 = arith.addf %362, %361 : vector<2x32xf32>
    %364 = arith.divf %362, %363 : vector<2x32xf32>
    %365 = vector.extract_strided_slice %352 {offsets = [0, 64], sizes = [2, 32], strides = [1, 1]} : vector<2x128xf32> to vector<2x32xf32>
    %366 = math.tanh %365 : vector<2x32xf32>
    %367 = vector.extract_strided_slice %352 {offsets = [0, 96], sizes = [2, 32], strides = [1, 1]} : vector<2x128xf32> to vector<2x32xf32>
    %368 = arith.negf %367 : vector<2x32xf32>
    %369 = math.exp %368 : vector<2x32xf32>
    %cst_122 = arith.constant 1.000000e+00 : f32
    %370 = vector.broadcast %cst_122 : f32 to vector<2x32xf32>
    %371 = arith.addf %370, %369 : vector<2x32xf32>
    %372 = arith.divf %370, %371 : vector<2x32xf32>
    %373 = arith.mulf %364, %341 : vector<2x32xf32>
    %374 = arith.mulf %358, %366 : vector<2x32xf32>
    %375 = arith.addf %373, %374 : vector<2x32xf32>
    %376 = math.tanh %375 : vector<2x32xf32>
    %377 = arith.mulf %372, %376 : vector<2x32xf32>
    %378 = arith.index_cast %c1_i32_116 : i32 to index
    %c0_123 = arith.constant 0 : index
    %c0_124 = arith.constant 0 : index
    %379 = vector.load %arg10[%378, %c0_123, %c0_124] : memref<8x2x32xf32, #tpu.memory_space<vmem>>, vector<1x2x32xf32>
    %380 = vector.shape_cast %379 : vector<1x2x32xf32> to vector<2x32xf32>
    %381 = vector.shape_cast %377 : vector<2x32xf32> to vector<1x2x32xf32>
    tpu.vector_store %arg10[%378, %c0_123, %c0_124], %381 {strides = array<i32>} : memref<8x2x32xf32, #tpu.memory_space<vmem>>, vector<1x2x32xf32>,
    %c2_i32_125 = arith.constant 2 : i32
    %382 = arith.index_cast %c2_i32_125 : i32 to index
    %c0_126 = arith.constant 0 : index
    %c0_127 = arith.constant 0 : index
    %383 = vector.load %arg14[%382, %c0_126, %c0_127] : memref<8x2x128xf32, #tpu.memory_space<vmem>>, vector<1x2x128xf32>
    %384 = vector.shape_cast %383 : vector<1x2x128xf32> to vector<2x128xf32>
    %cst_128 = arith.constant dense<0.000000e+00> : vector<2x128xf32>
    %385 = tpu.matmul %377, %300, %cst_128 {dimension_numbers = #tpu.dot_dimension_numbers<[1], [0], [0], [1], [0, 0, 1, 1], [], []>} : vector<2x32xf32>, vector<32x128xf32>, vector<2x128xf32> -> vector<2x128xf32>
    %386 = arith.addf %384, %385 : vector<2x128xf32>
    %387 = vector.extract_strided_slice %386 {offsets = [0, 0], sizes = [2, 32], strides = [1, 1]} : vector<2x128xf32> to vector<2x32xf32>
    %388 = arith.negf %387 : vector<2x32xf32>
    %389 = math.exp %388 : vector<2x32xf32>
    %cst_129 = arith.constant 1.000000e+00 : f32
    %390 = vector.broadcast %cst_129 : f32 to vector<2x32xf32>
    %391 = arith.addf %390, %389 : vector<2x32xf32>
    %392 = arith.divf %390, %391 : vector<2x32xf32>
    %393 = vector.extract_strided_slice %386 {offsets = [0, 32], sizes = [2, 32], strides = [1, 1]} : vector<2x128xf32> to vector<2x32xf32>
    %394 = arith.negf %393 : vector<2x32xf32>
    %395 = math.exp %394 : vector<2x32xf32>
    %cst_130 = arith.constant 1.000000e+00 : f32
    %396 = vector.broadcast %cst_130 : f32 to vector<2x32xf32>
    %397 = arith.addf %396, %395 : vector<2x32xf32>
    %398 = arith.divf %396, %397 : vector<2x32xf32>
    %399 = vector.extract_strided_slice %386 {offsets = [0, 64], sizes = [2, 32], strides = [1, 1]} : vector<2x128xf32> to vector<2x32xf32>
    %400 = math.tanh %399 : vector<2x32xf32>
    %401 = vector.extract_strided_slice %386 {offsets = [0, 96], sizes = [2, 32], strides = [1, 1]} : vector<2x128xf32> to vector<2x32xf32>
    %402 = arith.negf %401 : vector<2x32xf32>
    %403 = math.exp %402 : vector<2x32xf32>
    %cst_131 = arith.constant 1.000000e+00 : f32
    %404 = vector.broadcast %cst_131 : f32 to vector<2x32xf32>
    %405 = arith.addf %404, %403 : vector<2x32xf32>
    %406 = arith.divf %404, %405 : vector<2x32xf32>
    %407 = arith.mulf %398, %375 : vector<2x32xf32>
    %408 = arith.mulf %392, %400 : vector<2x32xf32>
    %409 = arith.addf %407, %408 : vector<2x32xf32>
    %410 = math.tanh %409 : vector<2x32xf32>
    %411 = arith.mulf %406, %410 : vector<2x32xf32>
    %412 = arith.index_cast %c2_i32_125 : i32 to index
    %c0_132 = arith.constant 0 : index
    %c0_133 = arith.constant 0 : index
    %413 = vector.load %arg10[%412, %c0_132, %c0_133] : memref<8x2x32xf32, #tpu.memory_space<vmem>>, vector<1x2x32xf32>
    %414 = vector.shape_cast %413 : vector<1x2x32xf32> to vector<2x32xf32>
    %415 = vector.shape_cast %411 : vector<2x32xf32> to vector<1x2x32xf32>
    tpu.vector_store %arg10[%412, %c0_132, %c0_133], %415 {strides = array<i32>} : memref<8x2x32xf32, #tpu.memory_space<vmem>>, vector<1x2x32xf32>,
    %c3_i32_134 = arith.constant 3 : i32
    %416 = arith.index_cast %c3_i32_134 : i32 to index
    %c0_135 = arith.constant 0 : index
    %c0_136 = arith.constant 0 : index
    %417 = vector.load %arg14[%416, %c0_135, %c0_136] : memref<8x2x128xf32, #tpu.memory_space<vmem>>, vector<1x2x128xf32>
    %418 = vector.shape_cast %417 : vector<1x2x128xf32> to vector<2x128xf32>
    %cst_137 = arith.constant dense<0.000000e+00> : vector<2x128xf32>
    %419 = tpu.matmul %411, %300, %cst_137 {dimension_numbers = #tpu.dot_dimension_numbers<[1], [0], [0], [1], [0, 0, 1, 1], [], []>} : vector<2x32xf32>, vector<32x128xf32>, vector<2x128xf32> -> vector<2x128xf32>
    %420 = arith.addf %418, %419 : vector<2x128xf32>
    %421 = vector.extract_strided_slice %420 {offsets = [0, 0], sizes = [2, 32], strides = [1, 1]} : vector<2x128xf32> to vector<2x32xf32>
    %422 = arith.negf %421 : vector<2x32xf32>
    %423 = math.exp %422 : vector<2x32xf32>
    %cst_138 = arith.constant 1.000000e+00 : f32
    %424 = vector.broadcast %cst_138 : f32 to vector<2x32xf32>
    %425 = arith.addf %424, %423 : vector<2x32xf32>
    %426 = arith.divf %424, %425 : vector<2x32xf32>
    %427 = vector.extract_strided_slice %420 {offsets = [0, 32], sizes = [2, 32], strides = [1, 1]} : vector<2x128xf32> to vector<2x32xf32>
    %428 = arith.negf %427 : vector<2x32xf32>
    %429 = math.exp %428 : vector<2x32xf32>
    %cst_139 = arith.constant 1.000000e+00 : f32
    %430 = vector.broadcast %cst_139 : f32 to vector<2x32xf32>
    %431 = arith.addf %430, %429 : vector<2x32xf32>
    %432 = arith.divf %430, %431 : vector<2x32xf32>
    %433 = vector.extract_strided_slice %420 {offsets = [0, 64], sizes = [2, 32], strides = [1, 1]} : vector<2x128xf32> to vector<2x32xf32>
    %434 = math.tanh %433 : vector<2x32xf32>
    %435 = vector.extract_strided_slice %420 {offsets = [0, 96], sizes = [2, 32], strides = [1, 1]} : vector<2x128xf32> to vector<2x32xf32>
    %436 = arith.negf %435 : vector<2x32xf32>
    %437 = math.exp %436 : vector<2x32xf32>
    %cst_140 = arith.constant 1.000000e+00 : f32
    %438 = vector.broadcast %cst_140 : f32 to vector<2x32xf32>
    %439 = arith.addf %438, %437 : vector<2x32xf32>
    %440 = arith.divf %438, %439 : vector<2x32xf32>
    %441 = arith.mulf %432, %409 : vector<2x32xf32>
    %442 = arith.mulf %426, %434 : vector<2x32xf32>
    %443 = arith.addf %441, %442 : vector<2x32xf32>
    %444 = math.tanh %443 : vector<2x32xf32>
    %445 = arith.mulf %440, %444 : vector<2x32xf32>
    %446 = arith.index_cast %c3_i32_134 : i32 to index
    %c0_141 = arith.constant 0 : index
    %c0_142 = arith.constant 0 : index
    %447 = vector.load %arg10[%446, %c0_141, %c0_142] : memref<8x2x32xf32, #tpu.memory_space<vmem>>, vector<1x2x32xf32>
    %448 = vector.shape_cast %447 : vector<1x2x32xf32> to vector<2x32xf32>
    %449 = vector.shape_cast %445 : vector<2x32xf32> to vector<1x2x32xf32>
    tpu.vector_store %arg10[%446, %c0_141, %c0_142], %449 {strides = array<i32>} : memref<8x2x32xf32, #tpu.memory_space<vmem>>, vector<1x2x32xf32>,
    %c4_i32_143 = arith.constant 4 : i32
    %450 = arith.index_cast %c4_i32_143 : i32 to index
    %c0_144 = arith.constant 0 : index
    %c0_145 = arith.constant 0 : index
    %451 = vector.load %arg14[%450, %c0_144, %c0_145] : memref<8x2x128xf32, #tpu.memory_space<vmem>>, vector<1x2x128xf32>
    %452 = vector.shape_cast %451 : vector<1x2x128xf32> to vector<2x128xf32>
    %cst_146 = arith.constant dense<0.000000e+00> : vector<2x128xf32>
    %453 = tpu.matmul %445, %300, %cst_146 {dimension_numbers = #tpu.dot_dimension_numbers<[1], [0], [0], [1], [0, 0, 1, 1], [], []>} : vector<2x32xf32>, vector<32x128xf32>, vector<2x128xf32> -> vector<2x128xf32>
    %454 = arith.addf %452, %453 : vector<2x128xf32>
    %455 = vector.extract_strided_slice %454 {offsets = [0, 0], sizes = [2, 32], strides = [1, 1]} : vector<2x128xf32> to vector<2x32xf32>
    %456 = arith.negf %455 : vector<2x32xf32>
    %457 = math.exp %456 : vector<2x32xf32>
    %cst_147 = arith.constant 1.000000e+00 : f32
    %458 = vector.broadcast %cst_147 : f32 to vector<2x32xf32>
    %459 = arith.addf %458, %457 : vector<2x32xf32>
    %460 = arith.divf %458, %459 : vector<2x32xf32>
    %461 = vector.extract_strided_slice %454 {offsets = [0, 32], sizes = [2, 32], strides = [1, 1]} : vector<2x128xf32> to vector<2x32xf32>
    %462 = arith.negf %461 : vector<2x32xf32>
    %463 = math.exp %462 : vector<2x32xf32>
    %cst_148 = arith.constant 1.000000e+00 : f32
    %464 = vector.broadcast %cst_148 : f32 to vector<2x32xf32>
    %465 = arith.addf %464, %463 : vector<2x32xf32>
    %466 = arith.divf %464, %465 : vector<2x32xf32>
    %467 = vector.extract_strided_slice %454 {offsets = [0, 64], sizes = [2, 32], strides = [1, 1]} : vector<2x128xf32> to vector<2x32xf32>
    %468 = math.tanh %467 : vector<2x32xf32>
    %469 = vector.extract_strided_slice %454 {offsets = [0, 96], sizes = [2, 32], strides = [1, 1]} : vector<2x128xf32> to vector<2x32xf32>
    %470 = arith.negf %469 : vector<2x32xf32>
    %471 = math.exp %470 : vector<2x32xf32>
    %cst_149 = arith.constant 1.000000e+00 : f32
    %472 = vector.broadcast %cst_149 : f32 to vector<2x32xf32>
    %473 = arith.addf %472, %471 : vector<2x32xf32>
    %474 = arith.divf %472, %473 : vector<2x32xf32>
    %475 = arith.mulf %466, %443 : vector<2x32xf32>
    %476 = arith.mulf %460, %468 : vector<2x32xf32>
    %477 = arith.addf %475, %476 : vector<2x32xf32>
    %478 = math.tanh %477 : vector<2x32xf32>
    %479 = arith.mulf %474, %478 : vector<2x32xf32>
    %480 = arith.index_cast %c4_i32_143 : i32 to index
    %c0_150 = arith.constant 0 : index
    %c0_151 = arith.constant 0 : index
    %481 = vector.load %arg10[%480, %c0_150, %c0_151] : memref<8x2x32xf32, #tpu.memory_space<vmem>>, vector<1x2x32xf32>
    %482 = vector.shape_cast %481 : vector<1x2x32xf32> to vector<2x32xf32>
    %483 = vector.shape_cast %479 : vector<2x32xf32> to vector<1x2x32xf32>
    tpu.vector_store %arg10[%480, %c0_150, %c0_151], %483 {strides = array<i32>} : memref<8x2x32xf32, #tpu.memory_space<vmem>>, vector<1x2x32xf32>,
    %c5_i32_152 = arith.constant 5 : i32
    %484 = arith.index_cast %c5_i32_152 : i32 to index
    %c0_153 = arith.constant 0 : index
    %c0_154 = arith.constant 0 : index
    %485 = vector.load %arg14[%484, %c0_153, %c0_154] : memref<8x2x128xf32, #tpu.memory_space<vmem>>, vector<1x2x128xf32>
    %486 = vector.shape_cast %485 : vector<1x2x128xf32> to vector<2x128xf32>
    %cst_155 = arith.constant dense<0.000000e+00> : vector<2x128xf32>
    %487 = tpu.matmul %479, %300, %cst_155 {dimension_numbers = #tpu.dot_dimension_numbers<[1], [0], [0], [1], [0, 0, 1, 1], [], []>} : vector<2x32xf32>, vector<32x128xf32>, vector<2x128xf32> -> vector<2x128xf32>
    %488 = arith.addf %486, %487 : vector<2x128xf32>
    %489 = vector.extract_strided_slice %488 {offsets = [0, 0], sizes = [2, 32], strides = [1, 1]} : vector<2x128xf32> to vector<2x32xf32>
    %490 = arith.negf %489 : vector<2x32xf32>
    %491 = math.exp %490 : vector<2x32xf32>
    %cst_156 = arith.constant 1.000000e+00 : f32
    %492 = vector.broadcast %cst_156 : f32 to vector<2x32xf32>
    %493 = arith.addf %492, %491 : vector<2x32xf32>
    %494 = arith.divf %492, %493 : vector<2x32xf32>
    %495 = vector.extract_strided_slice %488 {offsets = [0, 32], sizes = [2, 32], strides = [1, 1]} : vector<2x128xf32> to vector<2x32xf32>
    %496 = arith.negf %495 : vector<2x32xf32>
    %497 = math.exp %496 : vector<2x32xf32>
    %cst_157 = arith.constant 1.000000e+00 : f32
    %498 = vector.broadcast %cst_157 : f32 to vector<2x32xf32>
    %499 = arith.addf %498, %497 : vector<2x32xf32>
    %500 = arith.divf %498, %499 : vector<2x32xf32>
    %501 = vector.extract_strided_slice %488 {offsets = [0, 64], sizes = [2, 32], strides = [1, 1]} : vector<2x128xf32> to vector<2x32xf32>
    %502 = math.tanh %501 : vector<2x32xf32>
    %503 = vector.extract_strided_slice %488 {offsets = [0, 96], sizes = [2, 32], strides = [1, 1]} : vector<2x128xf32> to vector<2x32xf32>
    %504 = arith.negf %503 : vector<2x32xf32>
    %505 = math.exp %504 : vector<2x32xf32>
    %cst_158 = arith.constant 1.000000e+00 : f32
    %506 = vector.broadcast %cst_158 : f32 to vector<2x32xf32>
    %507 = arith.addf %506, %505 : vector<2x32xf32>
    %508 = arith.divf %506, %507 : vector<2x32xf32>
    %509 = arith.mulf %500, %477 : vector<2x32xf32>
    %510 = arith.mulf %494, %502 : vector<2x32xf32>
    %511 = arith.addf %509, %510 : vector<2x32xf32>
    %512 = math.tanh %511 : vector<2x32xf32>
    %513 = arith.mulf %508, %512 : vector<2x32xf32>
    %514 = arith.index_cast %c5_i32_152 : i32 to index
    %c0_159 = arith.constant 0 : index
    %c0_160 = arith.constant 0 : index
    %515 = vector.load %arg10[%514, %c0_159, %c0_160] : memref<8x2x32xf32, #tpu.memory_space<vmem>>, vector<1x2x32xf32>
    %516 = vector.shape_cast %515 : vector<1x2x32xf32> to vector<2x32xf32>
    %517 = vector.shape_cast %513 : vector<2x32xf32> to vector<1x2x32xf32>
    tpu.vector_store %arg10[%514, %c0_159, %c0_160], %517 {strides = array<i32>} : memref<8x2x32xf32, #tpu.memory_space<vmem>>, vector<1x2x32xf32>,
    %c6_i32_161 = arith.constant 6 : i32
    %518 = arith.index_cast %c6_i32_161 : i32 to index
    %c0_162 = arith.constant 0 : index
    %c0_163 = arith.constant 0 : index
    %519 = vector.load %arg14[%518, %c0_162, %c0_163] : memref<8x2x128xf32, #tpu.memory_space<vmem>>, vector<1x2x128xf32>
    %520 = vector.shape_cast %519 : vector<1x2x128xf32> to vector<2x128xf32>
    %cst_164 = arith.constant dense<0.000000e+00> : vector<2x128xf32>
    %521 = tpu.matmul %513, %300, %cst_164 {dimension_numbers = #tpu.dot_dimension_numbers<[1], [0], [0], [1], [0, 0, 1, 1], [], []>} : vector<2x32xf32>, vector<32x128xf32>, vector<2x128xf32> -> vector<2x128xf32>
    %522 = arith.addf %520, %521 : vector<2x128xf32>
    %523 = vector.extract_strided_slice %522 {offsets = [0, 0], sizes = [2, 32], strides = [1, 1]} : vector<2x128xf32> to vector<2x32xf32>
    %524 = arith.negf %523 : vector<2x32xf32>
    %525 = math.exp %524 : vector<2x32xf32>
    %cst_165 = arith.constant 1.000000e+00 : f32
    %526 = vector.broadcast %cst_165 : f32 to vector<2x32xf32>
    %527 = arith.addf %526, %525 : vector<2x32xf32>
    %528 = arith.divf %526, %527 : vector<2x32xf32>
    %529 = vector.extract_strided_slice %522 {offsets = [0, 32], sizes = [2, 32], strides = [1, 1]} : vector<2x128xf32> to vector<2x32xf32>
    %530 = arith.negf %529 : vector<2x32xf32>
    %531 = math.exp %530 : vector<2x32xf32>
    %cst_166 = arith.constant 1.000000e+00 : f32
    %532 = vector.broadcast %cst_166 : f32 to vector<2x32xf32>
    %533 = arith.addf %532, %531 : vector<2x32xf32>
    %534 = arith.divf %532, %533 : vector<2x32xf32>
    %535 = vector.extract_strided_slice %522 {offsets = [0, 64], sizes = [2, 32], strides = [1, 1]} : vector<2x128xf32> to vector<2x32xf32>
    %536 = math.tanh %535 : vector<2x32xf32>
    %537 = vector.extract_strided_slice %522 {offsets = [0, 96], sizes = [2, 32], strides = [1, 1]} : vector<2x128xf32> to vector<2x32xf32>
    %538 = arith.negf %537 : vector<2x32xf32>
    %539 = math.exp %538 : vector<2x32xf32>
    %cst_167 = arith.constant 1.000000e+00 : f32
    %540 = vector.broadcast %cst_167 : f32 to vector<2x32xf32>
    %541 = arith.addf %540, %539 : vector<2x32xf32>
    %542 = arith.divf %540, %541 : vector<2x32xf32>
    %543 = arith.mulf %534, %511 : vector<2x32xf32>
    %544 = arith.mulf %528, %536 : vector<2x32xf32>
    %545 = arith.addf %543, %544 : vector<2x32xf32>
    %546 = math.tanh %545 : vector<2x32xf32>
    %547 = arith.mulf %542, %546 : vector<2x32xf32>
    %548 = arith.index_cast %c6_i32_161 : i32 to index
    %c0_168 = arith.constant 0 : index
    %c0_169 = arith.constant 0 : index
    %549 = vector.load %arg10[%548, %c0_168, %c0_169] : memref<8x2x32xf32, #tpu.memory_space<vmem>>, vector<1x2x32xf32>
    %550 = vector.shape_cast %549 : vector<1x2x32xf32> to vector<2x32xf32>
    %551 = vector.shape_cast %547 : vector<2x32xf32> to vector<1x2x32xf32>
    tpu.vector_store %arg10[%548, %c0_168, %c0_169], %551 {strides = array<i32>} : memref<8x2x32xf32, #tpu.memory_space<vmem>>, vector<1x2x32xf32>,
    %c7_i32_170 = arith.constant 7 : i32
    %552 = arith.index_cast %c7_i32_170 : i32 to index
    %c0_171 = arith.constant 0 : index
    %c0_172 = arith.constant 0 : index
    %553 = vector.load %arg14[%552, %c0_171, %c0_172] : memref<8x2x128xf32, #tpu.memory_space<vmem>>, vector<1x2x128xf32>
    %554 = vector.shape_cast %553 : vector<1x2x128xf32> to vector<2x128xf32>
    %cst_173 = arith.constant dense<0.000000e+00> : vector<2x128xf32>
    %555 = tpu.matmul %547, %300, %cst_173 {dimension_numbers = #tpu.dot_dimension_numbers<[1], [0], [0], [1], [0, 0, 1, 1], [], []>} : vector<2x32xf32>, vector<32x128xf32>, vector<2x128xf32> -> vector<2x128xf32>
    %556 = arith.addf %554, %555 : vector<2x128xf32>
    %557 = vector.extract_strided_slice %556 {offsets = [0, 0], sizes = [2, 32], strides = [1, 1]} : vector<2x128xf32> to vector<2x32xf32>
    %558 = arith.negf %557 : vector<2x32xf32>
    %559 = math.exp %558 : vector<2x32xf32>
    %cst_174 = arith.constant 1.000000e+00 : f32
    %560 = vector.broadcast %cst_174 : f32 to vector<2x32xf32>
    %561 = arith.addf %560, %559 : vector<2x32xf32>
    %562 = arith.divf %560, %561 : vector<2x32xf32>
    %563 = vector.extract_strided_slice %556 {offsets = [0, 32], sizes = [2, 32], strides = [1, 1]} : vector<2x128xf32> to vector<2x32xf32>
    %564 = arith.negf %563 : vector<2x32xf32>
    %565 = math.exp %564 : vector<2x32xf32>
    %cst_175 = arith.constant 1.000000e+00 : f32
    %566 = vector.broadcast %cst_175 : f32 to vector<2x32xf32>
    %567 = arith.addf %566, %565 : vector<2x32xf32>
    %568 = arith.divf %566, %567 : vector<2x32xf32>
    %569 = vector.extract_strided_slice %556 {offsets = [0, 64], sizes = [2, 32], strides = [1, 1]} : vector<2x128xf32> to vector<2x32xf32>
    %570 = math.tanh %569 : vector<2x32xf32>
    %571 = vector.extract_strided_slice %556 {offsets = [0, 96], sizes = [2, 32], strides = [1, 1]} : vector<2x128xf32> to vector<2x32xf32>
    %572 = arith.negf %571 : vector<2x32xf32>
    %573 = math.exp %572 : vector<2x32xf32>
    %cst_176 = arith.constant 1.000000e+00 : f32
    %574 = vector.broadcast %cst_176 : f32 to vector<2x32xf32>
    %575 = arith.addf %574, %573 : vector<2x32xf32>
    %576 = arith.divf %574, %575 : vector<2x32xf32>
    %577 = arith.mulf %568, %545 : vector<2x32xf32>
    %578 = arith.mulf %562, %570 : vector<2x32xf32>
    %579 = arith.addf %577, %578 : vector<2x32xf32>
    %580 = math.tanh %579 : vector<2x32xf32>
    %581 = arith.mulf %576, %580 : vector<2x32xf32>
    %582 = arith.index_cast %c7_i32_170 : i32 to index
    %c0_177 = arith.constant 0 : index
    %c0_178 = arith.constant 0 : index
    %583 = vector.load %arg10[%582, %c0_177, %c0_178] : memref<8x2x32xf32, #tpu.memory_space<vmem>>, vector<1x2x32xf32>
    %584 = vector.shape_cast %583 : vector<1x2x32xf32> to vector<2x32xf32>
    %585 = vector.shape_cast %581 : vector<2x32xf32> to vector<1x2x32xf32>
    tpu.vector_store %arg10[%582, %c0_177, %c0_178], %585 {strides = array<i32>} : memref<8x2x32xf32, #tpu.memory_space<vmem>>, vector<1x2x32xf32>,
    %c8_i32_179 = arith.constant 8 : i32
    %c1_180 = arith.constant 1 : index
    %c0_181 = arith.constant 0 : index
    %c0_182 = arith.constant 0 : index
    %586 = vector.load %arg11[%c1_180, %c0_181, %c0_182] : memref<2x2x32xf32, #tpu.memory_space<vmem>>, vector<1x2x32xf32>
    %587 = vector.shape_cast %586 : vector<1x2x32xf32> to vector<2x32xf32>
    %588 = vector.shape_cast %581 : vector<2x32xf32> to vector<1x2x32xf32>
    tpu.vector_store %arg11[%c1_180, %c0_181, %c0_182], %588 {strides = array<i32>} : memref<2x2x32xf32, #tpu.memory_space<vmem>>, vector<1x2x32xf32>,
    %c1_183 = arith.constant 1 : index
    %c0_184 = arith.constant 0 : index
    %c0_185 = arith.constant 0 : index
    %589 = vector.load %arg12[%c1_183, %c0_184, %c0_185] : memref<2x2x32xf32, #tpu.memory_space<vmem>>, vector<1x2x32xf32>
    %590 = vector.shape_cast %589 : vector<1x2x32xf32> to vector<2x32xf32>
    %591 = vector.shape_cast %579 : vector<2x32xf32> to vector<1x2x32xf32>
    tpu.vector_store %arg12[%c1_183, %c0_184, %c0_185], %591 {strides = array<i32>} : memref<2x2x32xf32, #tpu.memory_space<vmem>>, vector<1x2x32xf32>,
    return
  }
}

</mosaic_0001>

<bundles_post_ra>
// kernel: tpu_custom_call.1
= control target key start
LH: loop header
LB: loop body
LE: loop exit
PB: predicated region body
PF: predicated region fallthrough
CT: control target
= control target key end

     0   :  { %18 = vsyncpa [#allocation5], 0  ;;  %s3616_s0 = inlined_call_operand.vmem [shape: s32[8,2], index: 0, kind: input, shape index: {}]   ;;  %s3617_s1 = inlined_call_operand.vmem [shape: f32[32,16], index: 1, kind: input, shape index: {}]   ;;  %s3618_s2 = inlined_call_operand.hbm [shape: f32[2,2,32], index: 2, kind: input, shape index: {}]   ;;  %s3619_s3 = inlined_call_operand.vmem [shape: f32[2,2,32], index: 3, kind: input, shape index: {}]   ;;  %s3620_s4 = inlined_call_operand.hbm [shape: f32[16,128], index: 4, kind: input, shape index: {}]   ;;  %s3621_s5 = inlined_call_operand.vmem [shape: f32[32,128], index: 5, kind: input, shape index: {}]   ;;  %s3622_s6 = inlined_call_operand.vmem [shape: f32[1,128], index: 6, kind: input, shape index: {}]   ;;  %s3623_s7 = inlined_call_operand.vmem [shape: f32[32,128], index: 7, kind: input, shape index: {}]   ;;  %s3624_s8 = inlined_call_operand.hbm [shape: f32[32,128], index: 8, kind: input, shape index: {}]   ;;  %s3625_s9 = inlined_call_operand.vmem [shape: f32[1,128], index: 9, kind: input, shape index: {}]   ;;  %s3626_s10 = inlined_call_operand.hbm [shape: f32[8,2,32], index: 10, kind: output, shape index: {0}]   ;;  %s3627_s11 = inlined_call_operand.hbm [shape: f32[2,2,32], index: 11, kind: output, shape index: {1}]   ;;  %s3628_s12 = inlined_call_operand.hbm [shape: f32[2,2,32], index: 12, kind: output, shape index: {2}]  }
   0x1   :  { %19 = vsyncpa [#allocation8], 0 }
   0x2   :  { %20 = vsyncpa [#allocation6], 0 }
   0x3   :  { %21 = vsyncpa [#allocation12], 0  ;;  %s3140_s21 = smov [#allocation7]   ;;  %s3000_s25 = scalar_lea.hbm %s3620_s4, 256 }
   0x4   :  { %s45_s22 = sshll.u32 %s3140_s21, 4  ;;  %p3001_p0 = scmp.ne.s32.totalorder %s3620_s4, %s3000_s25  ;;  %s46_s22 = int_to_ptr.vmem [resolvable:$true] %s45_s22 }
   0x5   :  { %p3004_p1 = scmp.lt.u32.totalorder %s3000_s25, %s3620_s4 }
   0x7   :  { %p3006_p2 = pnand %p3004_p1, %p3001_p0 }
   0x9   :  { %3009 = shalt.err (!%p3006_p2)
}
   0xa   :  { %s3010_s30 = scalar_lea.vmem %s46_s22, 256  ;;  %p3015_p4 = scmp.lt.s32.totalorder %s46_s22, %s46_s22 }
   0xb   :  { %p3011_p3 = scmp.ne.s32.totalorder %s46_s22, %s3010_s30  ;;  %p3016_p5 = scmp.lt.s32.totalorder %s3010_s30, %s3010_s30 }
   0xd   :  { %p3017_p6 = por %p3016_p5, %p3015_p4 }
   0xf   :  { %p3018_p7 = pnand %p3017_p6, %p3011_p3 }
  0x11   :  { %3021 = shalt.err (!%p3018_p7)
}
  0x12   :  { %s3141_s13 = smov 128   ;;  %s3142_s14 = smov 8  }
  0x13   :  { %51 = dma.hbm_to_vmem [thread:$0]  %s3620_s4, 256, %s46_s22, [#allocation8], %s3141_s13, %s3141_s13, %s3142_s14  }
  0x14   :  { %s3143_s17 = smov [#allocation4]   ;;  %s3022_s21 = scalar_lea.hbm %s3618_s2, 64 }
  0x15   :  { %s31_s18 = sshll.u32 %s3143_s17, 4  ;;  %p3023_p8 = scmp.ne.s32.totalorder %s3618_s2, %s3022_s21  ;;  %s32_s18 = int_to_ptr.vmem [resolvable:$true] %s31_s18 }
  0x16   :  { %p3026_p9 = scmp.lt.u32.totalorder %s3022_s21, %s3618_s2 }
  0x18   :  { %p3028_p10 = pnand %p3026_p9, %p3023_p8 }
  0x1a   :  { %3031 = shalt.err (!%p3028_p10)
}
  0x1b   :  { %s3032_s27 = scalar_lea.vmem %s32_s18, 64  ;;  %p3037_p12 = scmp.lt.s32.totalorder %s32_s18, %s32_s18 }
  0x1c   :  { %p3033_p11 = scmp.ne.s32.totalorder %s32_s18, %s3032_s27  ;;  %p3038_p13 = scmp.lt.s32.totalorder %s3032_s27, %s3032_s27 }
  0x1e   :  { %p3039_p0 = por %p3038_p13, %p3037_p12 }
  0x20   :  { %p3040_p1 = pnand %p3039_p0, %p3033_p11 }
  0x22   :  { %3043 = shalt.err (!%p3040_p1)
}
  0x23   :  { %s3144_s4 = smov 32   ;;  %s3145_s22 = smov 2  }
  0x24   :  { %37 = dma.hbm_to_vmem [thread:$0]  %s3618_s2, 64, %s32_s18, [#allocation5], %s3144_s4, %s3144_s4, %s3145_s22  }
  0x25   :  { %s3146_s30 = smov [#allocation9]   ;;  %s3044_s19 = scalar_lea.hbm %s3624_s8, 512 }
  0x26   :  { %s63_s15 = sshll.u32 %s3146_s30, 4  ;;  %p3045_p2 = scmp.ne.s32.totalorder %s3624_s8, %s3044_s19  ;;  %s64_s15 = int_to_ptr.vmem [resolvable:$true] %s63_s15 }
  0x27   :  { %p3048_p3 = scmp.lt.u32.totalorder %s3044_s19, %s3624_s8 }
  0x29   :  { %p3050_p4 = pnand %p3048_p3, %p3045_p2 }
  0x2b   :  { %3053 = shalt.err (!%p3050_p4)
}
  0x2c   :  { %s3054_s25 = scalar_lea.vmem %s64_s15, 512  ;;  %p3059_p6 = scmp.lt.s32.totalorder %s64_s15, %s64_s15 }
  0x2d   :  { %p3055_p5 = scmp.ne.s32.totalorder %s64_s15, %s3054_s25  ;;  %p3060_p7 = scmp.lt.s32.totalorder %s3054_s25, %s3054_s25 }
  0x2f   :  { %p3061_p8 = por %p3060_p7, %p3059_p6 }
  0x31   :  { %p3062_p9 = pnand %p3061_p8, %p3055_p5 }
  0x33   :  { %3065 = shalt.err (!%p3062_p9)
}
  0x34   :  { %69 = dma.hbm_to_vmem [thread:$0]  %s3624_s8, 512, %s64_s15, [#allocation8], %s3141_s13, %s3141_s13, %s3142_s14  }
  0x35   :  { %3132 = dma.done.wait [#allocation5], 64  }
  0x36   :  { %3133 = vsyncadd [#allocation5], 4294967232 }
  0x37   :  { %3134 = dma.done.wait [#allocation8], 768  }
  0x38   :  { %3135 = vsyncadd [#allocation8], 4294966528  ;;  %v82_v0 = vlaneseq  ;;  %v81_v6 = vld [vmem:[%s3616_s0] sm:$0xff]  ;;  %v165_v8 = vld [vmem:[%s3617_s1 + $0x8] sm:$0xff]  ;;  %v3147_v28 = vmov 1983009808  }
  0x39   :  { %v164_v7 = vld [vmem:[%s3617_s1] sm:$0xff]  ;;  %v166_v16 = vld [vmem:[%s3617_s1 + $0x10] sm:$0xff]  ;;  %v167_v17 = vld [vmem:[%s3617_s1 + $0x18] sm:$0xff]  ;;  %v179_v29 = vunpack.c.l.s4 %v3147_v28  ;;  %v3148_v37 = vmov 0.0   ;;  %vm210_vm6 = vcmask 261120   ;;  %v3149_v62 = vmov 0.0|0.0  }
  0x3a   :  { %v85_v1 = vshrl.u32 %v82_v0, 7  ;;  %v2740_v15 = vpack.c.bf16 %v165_v8, %v164_v7  ;;  %v2744_v18 = vpack.c.bf16 %v167_v17, %v166_v16  ;;  %v294_v23 = vld [vmem:[#allocation7] sm:$0xff]  ;;  %v295_v24 = vld [vmem:[#allocation7 + $0x8] sm:$0xff]  ;;  %v83_v30 = vand.u32 127, %v82_v0  ;;  %v290_v60 = vld [vmem:[%s3621_s5] sm:$0xff]  ;;  %s3153_s1 = smov [#allocation11]  }
  0x3b   :  { %v2748_v27 = vpack.c.bf16 %v295_v24, %v294_v23  ;;  %v180_v33 = vunpack.c.0.s8 %v179_v29  ;;  %v291_v61 = vld [vmem:[%s3621_s5 + $0x8] sm:$0xff]  ;;  %v292_v0 = vld [vmem:[%s3621_s5 + $0x10] sm:$0xff]  ;;  %vm3150_vm9 = vmmov 0   ;;  %vm303_vm10 = vcmask 130048   ;;  %v2392_v7 = vld [vmem:[%s3622_s6] ss:$0 sm:$0xff] }
  0x3c   :  { %v100_v2 = vsub.s32 2, %v85_v1  ;;  %v86_v3 = vsub.s32 0, %v85_v1  ;;  %v107_v4 = vsub.s32 3, %v85_v1  ;;  %v93_v5 = vsub.s32 1, %v85_v1  ;;  %2741 = vmatprep.subr.bf16.mxu0 %v2740_v15  ;;  %s3151_s6 = smov 64   ;;  %s2350_s16 = sshll.u32 %s3153_s1, 4  ;;  %s2351_s16 = int_to_ptr.vmem [resolvable:$true] %s2350_s16 }
  0x3d   :  { %v121_v11 = vsub.s32 5, %v85_v1  ;;  %v114_v14 = vsub.s32 4, %v85_v1  ;;  %2743 = vmatpush3.bf16.msra.mxu0 %v2740_v15  ;;  %v135_v21 = vsub.s32 7, %v85_v1  ;;  %v128_v22 = vsub.s32 6, %v85_v1  ;;  %2749 = vmatprep.subr.bf16.mxu1 %v2748_v27  ;;  %s3154_s17 = smov [#allocation10]   ;;  %s3155_s20 = smov [#allocation13]  }
  0x3e   :  { %v101_v9 = vrot.slane %v81_v6, %v100_v2  ;;  %v87_v10 = vrot.slane %v81_v6, %v86_v3  ;;  %v108_v12 = vrot.slane %v81_v6, %v107_v4  ;;  %v94_v13 = vrot.slane %v81_v6, %v93_v5  ;;  %2745 = vmatprep.subr.bf16.mxu0 %v2744_v18  ;;  %v438_v3 = vld [vmem:[%s3619_s3] sm:$0x3]  ;;  %s2338_s19 = sshll.u32 %s3154_s17, 4  ;;  %s2362_s21 = sshll.u32 %s3155_s20, 4  ;;  %s3554_s19 = int_to_ptr.vmem [resolvable:$true] %s2338_s19  ;;  %s3558_s21 = int_to_ptr.vmem [resolvable:$true] %s2362_s21 }
  0x3f   :  { %v122_v19 = vrot.slane %v81_v6, %v121_v11  ;;  %v115_v20 = vrot.slane %v81_v6, %v114_v14  ;;  %v136_v25 = vrot.slane %v81_v6, %v135_v21  ;;  %v129_v26 = vrot.slane %v81_v6, %v128_v22  ;;  %2751 = vmatpush3.bf16.msra.mxu1 %v2748_v27  ;;  %v437_v6 = vld [vmem:[#allocation4] sm:$0x3]  ;;  %s3066_s23 = scalar_lea.vmem %s2351_s16, 64  ;;  %p3071_p11 = scmp.lt.s32.totalorder %s2351_s16, %s2351_s16 }
  0x40   :  { %103 = vbcast.lane.b32.xlu1 %v101_v9, 256  ;;  %89 = vbcast.lane.b32.xlu0 %v87_v10, 256  ;;  %v3281_v36 = vsub.s32 %v180_v33, %v85_v1  ;;  %v3304_v63 = vpack.c.bf16 %v291_v61, %v290_v60  ;;  %v293_v1 = vld [vmem:[%s3621_s5 + $0x18] sm:$0xff]  ;;  %vm546_vm11 = vcmask 254976   ;;  %p3067_p10 = scmp.ne.s32.totalorder %s2351_s16, %s3066_s23  ;;  %p3072_p12 = scmp.lt.s32.totalorder %s3066_s23, %s3066_s23 }
  0x41   :  { %2747 = vmatpush3.bf16.msra.mxu0 %v2744_v18  ;;  %2752 = vmatprep.subr.bf16.mxu1 %v3149_v62  ;;  %v3315_v2 = vpack.c.bf16 %v293_v1, %v292_v0 }
  0x42   :  { %2758 = vmatprep.subr.bf16.mxu0 %v3149_v62  ;;  %p3073_p13 = por %p3072_p12, %p3071_p11 }
  0x44   :  { %110 = vbcast.lane.b32.xlu1 %v108_v12, 256  ;;  %96 = vbcast.lane.b32.xlu0 %v94_v13, 256  ;;  %p3074_p0 = pnand %p3073_p13, %p3067_p10 }
  0x48   :  { %124 = vbcast.lane.b32.xlu1 %v122_v19, 256  ;;  %117 = vbcast.lane.b32.xlu0 %v115_v20, 256 }
  0x4c   :  { %138 = vbcast.lane.b32.xlu1 %v136_v25, 256  ;;  %131 = vbcast.lane.b32.xlu0 %v129_v26, 256 }
  0x50   :  { %522 = vrot.lane.b32.xlu1 %v438_v3, %s3144_s4 }
  0xb2   :  { %v104_v31 = vpop.permute.xlu1 %103  ;;  %v90_v32 = vpop.permute.xlu0 %89 }
  0xb3   :  { %vm142_vm0 = vcmp.eq.s32.totalorder %v104_v31, %v83_v30  ;;  %vm140_vm1 = vcmp.eq.s32.totalorder %v90_v32, %v83_v30 }
  0xb4   :  { %v2384_v38 = vsel %vm142_vm0, 1.0, %v3148_v37  ;;  %v2382_v39 = vsel %vm140_vm1, 1.0, %v3148_v37 }
  0xb6   :  { %v111_v34 = vpop.permute.xlu1 %110  ;;  %v97_v35 = vpop.permute.xlu0 %96 }
  0xb7   :  { %vm143_vm2 = vcmp.eq.s32.totalorder %v111_v34, %v83_v30  ;;  %vm141_vm3 = vcmp.eq.s32.totalorder %v97_v35, %v83_v30 }
  0xb8   :  { %v2385_v40 = vsel %vm143_vm2, 1.0, %v3148_v37  ;;  %v2383_v41 = vsel %vm141_vm3, 1.0, %v3148_v37 }
  0xb9   :  { %v177_v42 = vcombine.low %v2384_v38, %v2385_v40  ;;  %v176_v43 = vcombine.low %v2382_v39, %v2383_v41 }
  0xba   :  { %v125_v44 = vpop.permute.xlu1 %124  ;;  %v118_v45 = vpop.permute.xlu0 %117 }
  0xbb   :  { %vm145_vm4 = vcmp.eq.s32.totalorder %v125_v44, %v83_v30  ;;  %vm144_vm5 = vcmp.eq.s32.totalorder %v118_v45, %v83_v30  ;;  %v184_v46 = vrot.slane %v176_v43, %v3281_v36  ;;  %v191_v47 = vrot.slane %v177_v42, %v3281_v36 }
  0xbc   :  { %v2387_v48 = vsel %vm145_vm4, 1.0, %v3148_v37  ;;  %v2386_v49 = vsel %vm144_vm5, 1.0, %v3148_v37 }
  0xbd   :  { %v192_v50 = vcombine.low %v184_v46, %v191_v47  ;;  %v193_v53 = vcombine.low %v2386_v49, %v2387_v48 }
  0xbe   :  { %v139_v51 = vpop.permute.xlu1 %138  ;;  %v132_v52 = vpop.permute.xlu0 %131 }
  0xbf   :  { %vm147_vm7 = vcmp.eq.s32.totalorder %v139_v51, %v83_v30  ;;  %vm146_vm8 = vcmp.eq.s32.totalorder %v132_v52, %v83_v30  ;;  %2543 = vmatprep.mubr.msk.f32.mxu0 %vm210_vm6, %v192_v50  ;;  %v201_v57 = vrot.slane %v193_v53, %v3281_v36 }
  0xc0   :  { %v2389_v54 = vsel %vm147_vm7, 1.0, %v3148_v37  ;;  %v2388_v55 = vsel %vm146_vm8, 1.0, %v3148_v37 }
  0xc1   :  { %v194_v56 = vcombine.low %v2388_v55, %v2389_v54 }
  0xc2   :  { %v523_v33 = vpop.permute.xlu1 %522 }
  0xc3   :  { %v208_v58 = vrot.slane %v194_v56, %v3281_v36 }
  0xc5   :  { %v209_v59 = vcombine.low %v201_v57, %v208_v58 }
  0xc7   :  { %2544 = vmatmul.mubr.msk.f32.vlgmr.msra.gmra.mrb[0].mxu0 %vm210_vm6, %v209_v59 }
  0xc8   :  { %2760 = vmatpush3.bf16.msra.mxu0 %v3304_v63  ;;  %2572 = vmatprep.mubr.msk.f32.mxu0 %vm3150_vm9, %v3148_v37 }
  0xc9   :  { %2761 = vmatprep.subr.bf16.mxu0 %v3149_v62 }
  0xcc   :  { %2763 = vmatpush3.bf16.msra.mxu0 %v3315_v2 }
  0xcd   :  { %2770 = vmatprep.subr.bf16.mxu0 %v3149_v62 }
 0x19a   :  { %v2545_v4 = vpop.f32.mrb[0].mxu0 }
 0x19b   :  { %v281_v5 = vpop.f32.mrb[1].mxu0 }
 0x19c   :  { %2550 = vmatprep.mubr.msk.f32.mxu1 %vm303_vm10, %v281_v5 }
 0x19d   :  { %2551 = vmatmul.mubr.msk.f32.vlgmr.msra.gmra.mrb[0].mxu1 %vm303_vm10, %v2545_v4 }
 0x19e   :  { %2754 = vmatpush3.bf16.msra.mxu1 %v3304_v63  ;;  %2561 = vmatprep.mubr.msk.f32.mxu1 %vm3150_vm9, %v3148_v37 }
 0x19f   :  { %2755 = vmatprep.subr.bf16.mxu1 %v3149_v62 }
 0x1a2   :  { %2757 = vmatpush3.bf16.msra.mxu1 %v3315_v2 }
 0x1a3   :  { %2764 = vmatprep.subr.bf16.mxu1 %v3149_v62 }
 0x1a5   :  { %2562 = vmatmul.mubr.msk.f32.vlgmr.msra.gmra.mrb[2].mxu1 %vm210_vm6, %v437_v6 }
 0x1a6   :  { %2766 = vmatpush3.bf16.msra.mxu1 %v3304_v63  ;;  %2583 = vmatprep.mubr.msk.f32.mxu1 %vm3150_vm9, %v3148_v37 }
 0x1a7   :  { %2767 = vmatprep.subr.bf16.mxu1 %v3149_v62 }
 0x1aa   :  { %2769 = vmatpush3.bf16.msra.mxu1 %v3315_v2 }
 0x1ab   :  { %2776 = vmatprep.subr.bf16.mxu1 %v3149_v62 }
 0x270   :  { %v2552_v8 = vpop.f32.mrb[0].mxu1 }
 0x271   :  { %v382_v9 = vadd.f32 %v2552_v8, %v2392_v7  ;;  %v376_v10 = vpop.f32.mrb[1].mxu1 }
 0x272   :  { %v377_v11 = vadd.f32 %v2392_v7, %v376_v10 }
 0x273   :  { %v404_v12 = vcombine.high %v382_v9, %v382_v9  ;;  %v411_v13 = vrot.slane %v382_v9, %v3281_v36  ;;  %2397 = vst.sshfl [vmem:[#allocation3 + $0x8] sm:$0x3 pattern:$0x76325410] %v382_v9 }
 0x274   :  { %v387_v14 = vcombine.high %v377_v11, %v377_v11  ;;  %v394_v15 = vrot.slane %v377_v11, %v3281_v36  ;;  %2395 = vst.sshfl [vmem:[#allocation3] sm:$0x3 pattern:$0x76325410] %v377_v11 }
 0x275   :  { %v418_v16 = vrot.slane %v404_v12, %v3281_v36  ;;  %v419_v17 = vcombine.high %v411_v13, %v411_v13  ;;  %2398 = vst.sshfl [vmem:[#allocation3 + $0xc] sm:$0x3 pattern:$0x76325410] %v404_v12 }
 0x276   :  { %v401_v18 = vrot.slane %v387_v14, %v3281_v36  ;;  %v402_v19 = vcombine.high %v394_v15, %v394_v15  ;;  %2396 = vst.sshfl [vmem:[#allocation3 + $0x4] sm:$0x3 pattern:$0x76325410] %v387_v14 }
 0x277   :  { %v420_v20 = vcombine.high %v418_v16, %v418_v16  ;;  %434 = vst [vmem:[#allocation3 + $0xa] sm:$0x3] %v419_v17 }
 0x278   :  { %v403_v21 = vcombine.high %v401_v18, %v401_v18  ;;  %430 = vst [vmem:[#allocation3 + $0x2] sm:$0x3] %v402_v19  ;;  %v509_v22 = vpop.f32.mrb[2].mxu1 }
 0x279   :  { %436 = vst [vmem:[#allocation3 + $0xe] sm:$0x3] %v420_v20  ;;  %v2563_v23 = vpop.f32.mrb[3].mxu1 }
 0x27a   :  { %432 = vst [vmem:[#allocation3 + $0x6] sm:$0x3] %v403_v21 }
 0x27b   :  { %v439_v24 = vld [vmem:[#allocation3] sm:$0x3] }
 0x27c   :  { %v513_v25 = vadd.f32 %v509_v22, %v439_v24 }
 0x27d   :  { %v654_v61 = vld [vmem:[#allocation3 + $0x4] sm:$0x3] }
 0x27e   :  { %2872 = vtanh.f32 %v513_v25  ;;  %v2400_v27 = vmul.f32 -1.442695, %v513_v25 }
 0x27f   :  { %v549_v43 = vld [vmem:[#allocation3 + $0x2] sm:$0x3] }
 0x280   :  { %2874 = vpow2.f32 %v2400_v27 }
 0x281   :  { %v759_v18 = vld [vmem:[#allocation3 + $0x6] sm:$0x3] }
 0x288   :  { %v2873_v26 = vpop.eup %2872 }
 0x289   :  { %527 = vrot.lane.b32.xlu0 %v2873_v26, %s3151_s6 }
 0x28a   :  { %v2875_v28 = vpop.eup %2874 }
 0x28b   :  { %v517_v29 = vadd.f32 1.0, %v2875_v28 }
 0x28d   :  { %2876 = vrcp.f32 %v517_v29 }
 0x297   :  { %v2877_v30 = vpop.eup %2876 }
 0x298   :  { %v525_v34 = vmul.f32 %v2877_v30, %v523_v33 }
 0x2fb   :  { %v528_v31 = vpop.permute.xlu0 %527 }
 0x2fc   :  { %v530_v32 = vmul.f32 %v2877_v30, %v528_v31 }
 0x2fe   :  { %532 = vrot.lane.b32.xlu0 %v530_v32, %s3144_s4 }
 0x370   :  { %v533_v35 = vpop.permute.xlu0 %532 }
 0x371   :  { %v535_v38 = vadd.f32 %v533_v35, %v525_v34 }
 0x373   :  { %2878 = vtanh.f32 %v535_v38 }
 0x37d   :  { %v2879_v39 = vpop.eup %2878 }
 0x37e   :  { %538 = vrot.lane.b32.xlu1 %v2879_v39, %s3151_s6 }
 0x3f0   :  { %v539_v40 = vpop.permute.xlu1 %538 }
 0x3f1   :  { %v541_v41 = vmul.f32 %v2877_v30, %v539_v40 }
 0x3f3   :  { %543 = vrot.lane.b32.xlu0 %v541_v41, %s3144_s4 }
 0x465   :  { %v544_v42 = vpop.permute.xlu0 %543 }
 0x466   :  { %547 = vst.msk [vmem:[#allocation2] sm:$0x3] %vm546_vm11, %v544_v42  ;;  %2573 = vmatmul.mubr.msk.f32.vlgmr.msra.gmra.mrb[2].mxu0 %vm210_vm6, %v544_v42 }
 0x467   :  { %2772 = vmatpush3.bf16.msra.mxu0 %v3304_v63  ;;  %2594 = vmatprep.mubr.msk.f32.mxu0 %vm3150_vm9, %v3148_v37 }
 0x468   :  { %2773 = vmatprep.subr.bf16.mxu0 %v3149_v62 }
 0x46b   :  { %2775 = vmatpush3.bf16.msra.mxu0 %v3315_v2 }
 0x46c   :  { %2782 = vmatprep.subr.bf16.mxu0 %v3149_v62 }
 0x539   :  { %v618_v44 = vpop.f32.mrb[2].mxu0 }
 0x53a   :  { %v622_v45 = vadd.f32 %v618_v44, %v549_v43  ;;  %v2574_v46 = vpop.f32.mrb[3].mxu0 }
 0x53c   :  { %2880 = vtanh.f32 %v622_v45  ;;  %v2402_v48 = vmul.f32 -1.442695, %v622_v45 }
 0x53e   :  { %2882 = vpow2.f32 %v2402_v48 }
 0x546   :  { %v2881_v47 = vpop.eup %2880 }
 0x547   :  { %632 = vrot.lane.b32.xlu1 %v2881_v47, %s3151_s6 }
 0x548   :  { %v2883_v49 = vpop.eup %2882 }
 0x549   :  { %v626_v50 = vadd.f32 1.0, %v2883_v49 }
 0x54b   :  { %2884 = vrcp.f32 %v626_v50 }
 0x555   :  { %v2885_v51 = vpop.eup %2884 }
 0x556   :  { %v630_v54 = vmul.f32 %v2885_v51, %v535_v38  ;;  %v864_v38 = vld [vmem:[#allocation3 + $0x8] sm:$0x3] }
 0x5b9   :  { %v633_v52 = vpop.permute.xlu1 %632 }
 0x5ba   :  { %v635_v53 = vmul.f32 %v2885_v51, %v633_v52 }
 0x5bc   :  { %637 = vrot.lane.b32.xlu0 %v635_v53, %s3144_s4 }
 0x62e   :  { %v638_v55 = vpop.permute.xlu0 %637 }
 0x62f   :  { %v640_v56 = vadd.f32 %v638_v55, %v630_v54 }
 0x631   :  { %2886 = vtanh.f32 %v640_v56 }
 0x63b   :  { %v2887_v57 = vpop.eup %2886 }
 0x63c   :  { %643 = vrot.lane.b32.xlu1 %v2887_v57, %s3151_s6 }
 0x6ae   :  { %v644_v58 = vpop.permute.xlu1 %643 }
 0x6af   :  { %v646_v59 = vmul.f32 %v2885_v51, %v644_v58 }
 0x6b1   :  { %648 = vrot.lane.b32.xlu0 %v646_v59, %s3144_s4 }
 0x723   :  { %v649_v60 = vpop.permute.xlu0 %648 }
 0x724   :  { %652 = vst.msk [vmem:[#allocation2 + $0x2] sm:$0x3] %vm546_vm11, %v649_v60  ;;  %2584 = vmatmul.mubr.msk.f32.vlgmr.msra.gmra.mrb[4].mxu1 %vm210_vm6, %v649_v60 }
 0x725   :  { %2778 = vmatpush3.bf16.msra.mxu1 %v3304_v63  ;;  %2605 = vmatprep.mubr.msk.f32.mxu1 %vm3150_vm9, %v3148_v37 }
 0x726   :  { %2779 = vmatprep.subr.bf16.mxu1 %v3149_v62 }
 0x729   :  { %2781 = vmatpush3.bf16.msra.mxu1 %v3315_v2 }
 0x72a   :  { %2788 = vmatprep.subr.bf16.mxu1 %v3149_v62 }
 0x7f7   :  { %v723_v0 = vpop.f32.mrb[4].mxu1 }
 0x7f8   :  { %v727_v1 = vadd.f32 %v723_v0, %v654_v61  ;;  %v2585_v3 = vpop.f32.mrb[5].mxu1 }
 0x7fa   :  { %2888 = vtanh.f32 %v727_v1  ;;  %v2404_v5 = vmul.f32 -1.442695, %v727_v1 }
 0x7fc   :  { %2890 = vpow2.f32 %v2404_v5 }
 0x804   :  { %v2889_v4 = vpop.eup %2888 }
 0x805   :  { %737 = vrot.lane.b32.xlu1 %v2889_v4, %s3151_s6 }
 0x806   :  { %v2891_v6 = vpop.eup %2890 }
 0x807   :  { %v731_v7 = vadd.f32 1.0, %v2891_v6 }
 0x809   :  { %2892 = vrcp.f32 %v731_v7 }
 0x813   :  { %v2893_v8 = vpop.eup %2892 }
 0x814   :  { %v735_v11 = vmul.f32 %v2893_v8, %v640_v56  ;;  %v969_v56 = vld [vmem:[#allocation3 + $0xa] sm:$0x3] }
 0x877   :  { %v738_v9 = vpop.permute.xlu1 %737 }
 0x878   :  { %v740_v10 = vmul.f32 %v2893_v8, %v738_v9 }
 0x87a   :  { %742 = vrot.lane.b32.xlu0 %v740_v10, %s3144_s4 }
 0x8ec   :  { %v743_v12 = vpop.permute.xlu0 %742 }
 0x8ed   :  { %v745_v13 = vadd.f32 %v743_v12, %v735_v11  ;;  %v1294_v11 = vld [vmem:[#allocation2 + $0x2] sm:$0x3] }
 0x8ef   :  { %2894 = vtanh.f32 %v745_v13 }
 0x8f9   :  { %v2895_v14 = vpop.eup %2894 }
 0x8fa   :  { %748 = vrot.lane.b32.xlu1 %v2895_v14, %s3151_s6  ;;  %v1293_v14 = vld [vmem:[#allocation2] sm:$0x3] }
 0x96c   :  { %v749_v15 = vpop.permute.xlu1 %748 }
 0x96d   :  { %v751_v16 = vmul.f32 %v2893_v8, %v749_v15  ;;  %v1320_v15 = vcombine.low %v1293_v14, %v1294_v11 }
 0x96f   :  { %753 = vrot.lane.b32.xlu0 %v751_v16, %s3144_s4 }
 0x9e1   :  { %v754_v17 = vpop.permute.xlu0 %753 }
 0x9e2   :  { %757 = vst.msk [vmem:[#allocation2 + $0x4] sm:$0x3] %vm546_vm11, %v754_v17  ;;  %2595 = vmatmul.mubr.msk.f32.vlgmr.msra.gmra.mrb[4].mxu0 %vm210_vm6, %v754_v17  ;;  %v1328_v17 = vrot.slane %v1320_v15, %v3281_v36 }
 0x9e3   :  { %2784 = vmatpush3.bf16.msra.mxu0 %v3304_v63  ;;  %2616 = vmatprep.mubr.msk.f32.mxu0 %vm3150_vm9, %v3148_v37 }
 0x9e4   :  { %2785 = vmatprep.subr.bf16.mxu0 %v3149_v62 }
 0x9e7   :  { %2787 = vmatpush3.bf16.msra.mxu0 %v3315_v2 }
 0x9e8   :  { %2794 = vmatprep.subr.bf16.mxu0 %v3149_v62 }
 0x9e9   :  { %v1295_v12 = vld [vmem:[#allocation2 + $0x4] sm:$0x3] }
 0xab5   :  { %v828_v19 = vpop.f32.mrb[4].mxu0 }
 0xab6   :  { %v832_v20 = vadd.f32 %v828_v19, %v759_v18  ;;  %v2596_v21 = vpop.f32.mrb[5].mxu0 }
 0xab8   :  { %2896 = vtanh.f32 %v832_v20  ;;  %v2406_v23 = vmul.f32 -1.442695, %v832_v20  ;;  %v1074_v20 = vld [vmem:[#allocation3 + $0xc] sm:$0x3] }
 0xaba   :  { %2898 = vpow2.f32 %v2406_v23 }
 0xac2   :  { %v2897_v22 = vpop.eup %2896 }
 0xac3   :  { %842 = vrot.lane.b32.xlu1 %v2897_v22, %s3151_s6 }
 0xac4   :  { %v2899_v24 = vpop.eup %2898 }
 0xac5   :  { %v836_v25 = vadd.f32 1.0, %v2899_v24 }
 0xac7   :  { %2900 = vrcp.f32 %v836_v25 }
 0xad1   :  { %v2901_v26 = vpop.eup %2900 }
 0xad2   :  { %v840_v29 = vmul.f32 %v2901_v26, %v745_v13 }
 0xb35   :  { %v843_v27 = vpop.permute.xlu1 %842 }
 0xb36   :  { %v845_v28 = vmul.f32 %v2901_v26, %v843_v27 }
 0xb38   :  { %847 = vrot.lane.b32.xlu0 %v845_v28, %s3144_s4 }
 0xbaa   :  { %v848_v30 = vpop.permute.xlu0 %847 }
 0xbab   :  { %v850_v31 = vadd.f32 %v848_v30, %v840_v29 }
 0xbad   :  { %2902 = vtanh.f32 %v850_v31 }
 0xbb7   :  { %v2903_v32 = vpop.eup %2902 }
 0xbb8   :  { %853 = vrot.lane.b32.xlu1 %v2903_v32, %s3151_s6 }
 0xc2a   :  { %v854_v33 = vpop.permute.xlu1 %853 }
 0xc2b   :  { %v856_v34 = vmul.f32 %v2901_v26, %v854_v33 }
 0xc2d   :  { %858 = vrot.lane.b32.xlu0 %v856_v34, %s3144_s4 }
 0xc9f   :  { %v859_v35 = vpop.permute.xlu0 %858 }
 0xca0   :  { %862 = vst.msk [vmem:[#allocation2 + $0x6] sm:$0x3] %vm546_vm11, %v859_v35  ;;  %2606 = vmatmul.mubr.msk.f32.vlgmr.msra.gmra.mrb[6].mxu1 %vm210_vm6, %v859_v35 }
 0xca1   :  { %2790 = vmatpush3.bf16.msra.mxu1 %v3304_v63  ;;  %2627 = vmatprep.mubr.msk.f32.mxu1 %vm3150_vm9, %v3148_v37 }
 0xca2   :  { %2791 = vmatprep.subr.bf16.mxu1 %v3149_v62 }
 0xca5   :  { %2793 = vmatpush3.bf16.msra.mxu1 %v3315_v2 }
 0xca7   :  { %v1296_v10 = vld [vmem:[#allocation2 + $0x6] sm:$0x3] }
 0xca8   :  { %v1321_v13 = vcombine.low %v1295_v12, %v1296_v10 }
 0xcaa   :  { %v1335_v16 = vrot.slane %v1321_v13, %v3281_v36 }
 0xcac   :  { %v1336_v19 = vcombine.low %v1328_v17, %v1335_v16 }
 0xd73   :  { %v933_v39 = vpop.f32.mrb[6].mxu1 }
 0xd74   :  { %v937_v40 = vadd.f32 %v933_v39, %v864_v38  ;;  %v2607_v41 = vpop.f32.mrb[7].mxu1 }
 0xd76   :  { %2904 = vtanh.f32 %v937_v40  ;;  %v2408_v43 = vmul.f32 -1.442695, %v937_v40  ;;  %v1179_v40 = vld [vmem:[#allocation3 + $0xe] sm:$0x3] }
 0xd78   :  { %2906 = vpow2.f32 %v2408_v43 }
 0xd80   :  { %v2905_v42 = vpop.eup %2904 }
 0xd81   :  { %947 = vrot.lane.b32.xlu1 %v2905_v42, %s3151_s6 }
 0xd82   :  { %v2907_v44 = vpop.eup %2906 }
 0xd83   :  { %v941_v45 = vadd.f32 1.0, %v2907_v44 }
 0xd85   :  { %2908 = vrcp.f32 %v941_v45 }
 0xd8f   :  { %v2909_v46 = vpop.eup %2908 }
 0xd90   :  { %v945_v49 = vmul.f32 %v2909_v46, %v850_v31 }
 0xdf3   :  { %v948_v47 = vpop.permute.xlu1 %947 }
 0xdf4   :  { %v950_v48 = vmul.f32 %v2909_v46, %v948_v47 }
 0xdf6   :  { %952 = vrot.lane.b32.xlu0 %v950_v48, %s3144_s4 }
 0xe68   :  { %v953_v50 = vpop.permute.xlu0 %952 }
 0xe69   :  { %v955_v51 = vadd.f32 %v953_v50, %v945_v49 }
 0xe6b   :  { %2910 = vtanh.f32 %v955_v51 }
 0xe75   :  { %v2911_v52 = vpop.eup %2910 }
 0xe76   :  { %958 = vrot.lane.b32.xlu1 %v2911_v52, %s3151_s6 }
 0xee8   :  { %v959_v53 = vpop.permute.xlu1 %958 }
 0xee9   :  { %v961_v54 = vmul.f32 %v2909_v46, %v959_v53 }
 0xeeb   :  { %963 = vrot.lane.b32.xlu0 %v961_v54, %s3144_s4 }
 0xf5d   :  { %v964_v55 = vpop.permute.xlu0 %963 }
 0xf5e   :  { %967 = vst.msk [vmem:[#allocation2 + $0x8] sm:$0x3] %vm546_vm11, %v964_v55  ;;  %2617 = vmatmul.mubr.msk.f32.vlgmr.msra.gmra.mrb[6].mxu0 %vm210_vm6, %v964_v55  ;;  %v1301_v55 = vld [vmem:[%s3623_s7] sm:$0xff] }
 0xf5f   :  { %2796 = vmatpush3.bf16.msra.mxu0 %v3304_v63  ;;  %2638 = vmatprep.mubr.msk.f32.mxu0 %vm3150_vm9, %v3148_v37 }
 0xf60   :  { %2797 = vmatprep.subr.bf16.mxu0 %v3149_v62 }
 0xf63   :  { %2799 = vmatpush3.bf16.msra.mxu0 %v3315_v2 }
 0xf64   :  { %2808 = vmatprep.subr.bf16.mxu0 %v3149_v62 }
 0xf65   :  { %v1297_v10 = vld [vmem:[#allocation2 + $0x8] sm:$0x3] }
0x1031   :  { %v1038_v57 = vpop.f32.mrb[6].mxu0 }
0x1032   :  { %v1042_v58 = vadd.f32 %v1038_v57, %v969_v56  ;;  %v2618_v59 = vpop.f32.mrb[7].mxu0  ;;  %v1302_v56 = vld [vmem:[%s3623_s7 + $0x8] sm:$0xff]  ;;  %v1303_v57 = vld [vmem:[%s3623_s7 + $0x10] sm:$0xff] }
0x1033   :  { %v1304_v59 = vld [vmem:[%s3623_s7 + $0x18] sm:$0xff] }
0x1034   :  { %2912 = vtanh.f32 %v1042_v58  ;;  %v2410_v61 = vmul.f32 -1.442695, %v1042_v58  ;;  %v2800_v58 = vpack.c.bf16 %v1302_v56, %v1301_v55 }
0x1036   :  { %2914 = vpow2.f32 %v2410_v61  ;;  %2801 = vmatprep.subr.bf16.mxu1 %v2800_v58 }
0x103e   :  { %v2913_v60 = vpop.eup %2912 }
0x103f   :  { %1052 = vrot.lane.b32.xlu1 %v2913_v60, %s3151_s6  ;;  %v2804_v60 = vpack.c.bf16 %v1304_v59, %v1303_v57 }
0x1040   :  { %v2915_v63 = vpop.eup %2914 }
0x1041   :  { %v1046_v0 = vadd.f32 1.0, %v2915_v63 }
0x1043   :  { %2916 = vrcp.f32 %v1046_v0  ;;  %v1289_v0 = vld [vmem:[#allocation9] sm:$0xff] }
0x104d   :  { %v2917_v1 = vpop.eup %2916 }
0x104e   :  { %v1050_v2 = vmul.f32 %v2917_v1, %v955_v51 }
0x10b1   :  { %v1053_v3 = vpop.permute.xlu1 %1052 }
0x10b2   :  { %v1055_v4 = vmul.f32 %v2917_v1, %v1053_v3  ;;  %v1291_v3 = vld [vmem:[#allocation9 + $0x10] sm:$0xff] }
0x10b4   :  { %1057 = vrot.lane.b32.xlu0 %v1055_v4, %s3144_s4 }
0x1126   :  { %v1058_v5 = vpop.permute.xlu0 %1057 }
0x1127   :  { %v1060_v6 = vadd.f32 %v1058_v5, %v1050_v2  ;;  %v1292_v2 = vld [vmem:[#allocation9 + $0x18] sm:$0xff]  ;;  %v2422_v5 = vld [vmem:[%s3619_s3 + $0x2] sm:$0x3] }
0x1129   :  { %2918 = vtanh.f32 %v1060_v6 }
0x1133   :  { %v2919_v7 = vpop.eup %2918 }
0x1134   :  { %1063 = vrot.lane.b32.xlu1 %v2919_v7, %s3151_s6  ;;  %v1486_v7 = vld [vmem:[#allocation4 + $0x2] sm:$0x3] }
0x11a6   :  { %v1064_v8 = vpop.permute.xlu1 %1063 }
0x11a7   :  { %v1066_v9 = vmul.f32 %v2917_v1, %v1064_v8  ;;  %v1290_v1 = vld [vmem:[#allocation9 + $0x8] sm:$0xff] }
0x11a8   :  { %v3441_v4 = vpack.c.bf16 %v1290_v1, %v1289_v0 }
0x11a9   :  { %1068 = vrot.lane.b32.xlu0 %v1066_v9, %s3144_s4 }
0x121b   :  { %v1069_v18 = vpop.permute.xlu0 %1068 }
0x121c   :  { %1072 = vst.msk [vmem:[#allocation2 + $0xa] sm:$0x3] %vm546_vm11, %v1069_v18  ;;  %2628 = vmatmul.mubr.msk.f32.vlgmr.msra.gmra.mrb[8].mxu1 %vm210_vm6, %v1069_v18 }
0x121d   :  { %2649 = vmatprep.mubr.msk.f32.mxu1 %vm210_vm6, %v1336_v19  ;;  %2803 = vmatpush3.bf16.msra.mxu1 %v2800_v58 }
0x121e   :  { %2805 = vmatprep.subr.bf16.mxu1 %v2804_v60 }
0x1221   :  { %2807 = vmatpush3.bf16.msra.mxu1 %v2804_v60 }
0x1222   :  { %2814 = vmatprep.subr.bf16.mxu1 %v3149_v62 }
0x1223   :  { %v1298_v9 = vld [vmem:[#allocation2 + $0xa] sm:$0x3] }
0x1224   :  { %v1337_v11 = vcombine.low %v1297_v10, %v1298_v9 }
0x1226   :  { %v1345_v15 = vrot.slane %v1337_v11, %v3281_v36 }
0x12ef   :  { %v1143_v21 = vpop.f32.mrb[8].mxu1 }
0x12f0   :  { %v1147_v22 = vadd.f32 %v1143_v21, %v1074_v20  ;;  %v2629_v23 = vpop.f32.mrb[9].mxu1  ;;  %v2415_v20 = vld [vmem:[%s3625_s9] ss:$0 sm:$0xff]  ;;  %s3152_s9 = smov 96  }
0x12f2   :  { %2920 = vtanh.f32 %v1147_v22  ;;  %v2412_v25 = vmul.f32 -1.442695, %v1147_v22 }
0x12f4   :  { %2922 = vpow2.f32 %v2412_v25 }
0x12fc   :  { %v2921_v24 = vpop.eup %2920 }
0x12fd   :  { %1157 = vrot.lane.b32.xlu1 %v2921_v24, %s3151_s6 }
0x12fe   :  { %v2923_v26 = vpop.eup %2922 }
0x12ff   :  { %v1151_v27 = vadd.f32 1.0, %v2923_v26 }
0x1301   :  { %2924 = vrcp.f32 %v1151_v27 }
0x130b   :  { %v2925_v28 = vpop.eup %2924 }
0x130c   :  { %v1155_v31 = vmul.f32 %v2925_v28, %v1060_v6  ;;  %v3447_v6 = vpack.c.bf16 %v1292_v2, %v1291_v3 }
0x136f   :  { %v1158_v29 = vpop.permute.xlu1 %1157 }
0x1370   :  { %v1160_v30 = vmul.f32 %v2925_v28, %v1158_v29 }
0x1372   :  { %1162 = vrot.lane.b32.xlu0 %v1160_v30, %s3144_s4 }
0x13e4   :  { %v1163_v32 = vpop.permute.xlu0 %1162 }
0x13e5   :  { %v1165_v33 = vadd.f32 %v1163_v32, %v1155_v31 }
0x13e7   :  { %2926 = vtanh.f32 %v1165_v33 }
0x13f1   :  { %v2927_v34 = vpop.eup %2926 }
0x13f2   :  { %1168 = vrot.lane.b32.xlu1 %v2927_v34, %s3151_s6 }
0x1464   :  { %v1169_v35 = vpop.permute.xlu1 %1168 }
0x1465   :  { %v1171_v38 = vmul.f32 %v2925_v28, %v1169_v35 }
0x1467   :  { %1173 = vrot.lane.b32.xlu0 %v1171_v38, %s3144_s4 }
0x14d9   :  { %v1174_v39 = vpop.permute.xlu0 %1173 }
0x14da   :  { %1177 = vst.msk [vmem:[#allocation2 + $0xc] sm:$0x3] %vm546_vm11, %v1174_v39  ;;  %2639 = vmatmul.mubr.msk.f32.vlgmr.msra.gmra.mrb[8].mxu0 %vm210_vm6, %v1174_v39 }
0x14db   :  { %2660 = vmatprep.mubr.msk.f32.mxu0 %vm3150_vm9, %v3148_v37  ;;  %2810 = vmatpush3.bf16.msra.mxu0 %v3441_v4 }
0x14dc   :  { %2811 = vmatprep.subr.bf16.mxu0 %v3149_v62 }
0x14df   :  { %2813 = vmatpush3.bf16.msra.mxu0 %v3447_v6 }
0x14e0   :  { %2820 = vmatprep.subr.bf16.mxu0 %v3149_v62 }
0x14e1   :  { %v1299_v12 = vld [vmem:[#allocation2 + $0xc] sm:$0x3] }
0x14e2   :  { %2661 = vmatmul.mubr.msk.f32.vlgmr.msra.gmra.mrb[10].mxu0 %vm210_vm6, %v1486_v7 }
0x14e3   :  { %2822 = vmatpush3.bf16.msra.mxu0 %v3441_v4  ;;  %2682 = vmatprep.mubr.msk.f32.mxu0 %vm3150_vm9, %v3148_v37 }
0x14e4   :  { %2823 = vmatprep.subr.bf16.mxu0 %v3149_v62 }
0x14e7   :  { %2825 = vmatpush3.bf16.msra.mxu0 %v3447_v6 }
0x14e8   :  { %2832 = vmatprep.subr.bf16.mxu0 %v3149_v62 }
0x15ad   :  { %v1248_v41 = vpop.f32.mrb[8].mxu0 }
0x15ae   :  { %v1252_v42 = vadd.f32 %v1248_v41, %v1179_v40  ;;  %v2640_v43 = vpop.f32.mrb[9].mxu0 }
0x15b0   :  { %2928 = vtanh.f32 %v1252_v42  ;;  %v2414_v45 = vmul.f32 -1.442695, %v1252_v42 }
0x15b2   :  { %2930 = vpow2.f32 %v2414_v45 }
0x15b5   :  { %v1559_v18 = vpop.f32.mrb[10].mxu0 }
0x15b6   :  { %v2662_v19 = vpop.f32.mrb[11].mxu0 }
0x15ba   :  { %v2929_v44 = vpop.eup %2928 }
0x15bb   :  { %1262 = vrot.lane.b32.xlu1 %v2929_v44, %s3151_s6 }
0x15bc   :  { %v2931_v46 = vpop.eup %2930 }
0x15bd   :  { %v1256_v47 = vadd.f32 1.0, %v2931_v46 }
0x15bf   :  { %2932 = vrcp.f32 %v1256_v47 }
0x15c9   :  { %v2933_v48 = vpop.eup %2932 }
0x15ca   :  { %v1260_v51 = vmul.f32 %v2933_v48, %v1165_v33 }
0x162d   :  { %v1263_v49 = vpop.permute.xlu1 %1262 }
0x162e   :  { %v1265_v50 = vmul.f32 %v2933_v48, %v1263_v49 }
0x1630   :  { %1267 = vrot.lane.b32.xlu0 %v1265_v50, %s3144_s4 }
0x16a2   :  { %v1268_v52 = vpop.permute.xlu0 %1267 }
0x16a3   :  { %v3423_v53 = vadd.f32 %v1268_v52, %v1260_v51 }
0x16a5   :  { %2934 = vtanh.f32 %v3423_v53 }
0x16af   :  { %v2935_v54 = vpop.eup %2934 }
0x16b0   :  { %1273 = vrot.lane.b32.xlu1 %v2935_v54, %s3151_s6 }
0x1722   :  { %v1274_v61 = vpop.permute.xlu1 %1273 }
0x1723   :  { %v1276_v63 = vmul.f32 %v2933_v48, %v1274_v61 }
0x1725   :  { %1278 = vrot.lane.b32.xlu0 %v1276_v63, %s3144_s4 }
0x1729   :  { %1572 = vrot.lane.b32.xlu0 %v2422_v5, %s3144_s4 }
0x1797   :  { %v1279_v8 = vpop.permute.xlu0 %1278 }
0x1798   :  { %1282 = vst.msk [vmem:[#allocation2 + $0xe] sm:$0x3] %vm546_vm11, %v1279_v8  ;;  %1283 = vst.msk [vmem:[#allocation11] sm:$0x3] %vm546_vm11, %v1279_v8 }
0x179b   :  { %v1573_v45 = vpop.permute.xlu0 %1572 }
0x179f   :  { %v1300_v13 = vld [vmem:[#allocation2 + $0xe] sm:$0x3] }
0x17a0   :  { %v1338_v14 = vcombine.low %v1299_v12, %v1300_v13 }
0x17a2   :  { %v1352_v16 = vrot.slane %v1338_v14, %v3281_v36 }
0x17a4   :  { %v1353_v17 = vcombine.low %v1345_v15, %v1352_v16 }
0x17a6   :  { %2650 = vmatmul.mubr.msk.f32.vlgmr.msra.gmra.mrb[10].mxu1 %vm210_vm6, %v1353_v17 }
0x17a7   :  { %2816 = vmatpush3.bf16.msra.mxu1 %v3441_v4  ;;  %2671 = vmatprep.mubr.msk.f32.mxu1 %vm3150_vm9, %v3148_v37 }
0x17a8   :  { %2817 = vmatprep.subr.bf16.mxu1 %v3149_v62 }
0x17ab   :  { %2819 = vmatpush3.bf16.msra.mxu1 %v3447_v6 }
0x17ac   :  { %2826 = vmatprep.subr.bf16.mxu1 %v3149_v62 }
0x1879   :  { %v2651_v21 = vpop.f32.mrb[10].mxu1 }
0x187a   :  { %v1430_v22 = vadd.f32 %v2651_v21, %v2415_v20  ;;  %v1424_v23 = vpop.f32.mrb[11].mxu1 }
0x187b   :  { %v1425_v24 = vadd.f32 %v2415_v20, %v1424_v23 }
0x187c   :  { %v1452_v25 = vcombine.high %v1430_v22, %v1430_v22  ;;  %v1459_v26 = vrot.slane %v1430_v22, %v3281_v36  ;;  %2420 = vst.sshfl [vmem:[#allocation3 + $0x8] sm:$0x3 pattern:$0x76325410] %v1430_v22 }
0x187d   :  { %v1435_v27 = vcombine.high %v1425_v24, %v1425_v24  ;;  %v1442_v28 = vrot.slane %v1425_v24, %v3281_v36  ;;  %2418 = vst.sshfl [vmem:[#allocation3] sm:$0x3 pattern:$0x76325410] %v1425_v24 }
0x187e   :  { %v1466_v29 = vrot.slane %v1452_v25, %v3281_v36  ;;  %v1467_v30 = vcombine.high %v1459_v26, %v1459_v26  ;;  %2421 = vst.sshfl [vmem:[#allocation3 + $0xc] sm:$0x3 pattern:$0x76325410] %v1452_v25 }
0x187f   :  { %v1449_v31 = vrot.slane %v1435_v27, %v3281_v36  ;;  %v1450_v32 = vcombine.high %v1442_v28, %v1442_v28  ;;  %2419 = vst.sshfl [vmem:[#allocation3 + $0x4] sm:$0x3 pattern:$0x76325410] %v1435_v27 }
0x1880   :  { %v1468_v33 = vcombine.high %v1466_v29, %v1466_v29  ;;  %1482 = vst [vmem:[#allocation3 + $0xa] sm:$0x3] %v1467_v30 }
0x1881   :  { %v1451_v34 = vcombine.high %v1449_v31, %v1449_v31  ;;  %1478 = vst [vmem:[#allocation3 + $0x2] sm:$0x3] %v1450_v32 }
0x1882   :  { %1484 = vst [vmem:[#allocation3 + $0xe] sm:$0x3] %v1468_v33 }
0x1883   :  { %1480 = vst [vmem:[#allocation3 + $0x6] sm:$0x3] %v1451_v34 }
0x1884   :  { %v1489_v35 = vld [vmem:[#allocation3] sm:$0x3] }
0x1885   :  { %v1563_v38 = vadd.f32 %v1559_v18, %v1489_v35 }
0x1886   :  { %v1701_v11 = vld [vmem:[#allocation3 + $0x4] sm:$0x3] }
0x1887   :  { %2936 = vtanh.f32 %v1563_v38  ;;  %v2424_v40 = vmul.f32 -1.442695, %v1563_v38 }
0x1888   :  { %v1597_v54 = vld [vmem:[#allocation3 + $0x2] sm:$0x3] }
0x1889   :  { %2938 = vpow2.f32 %v2424_v40 }
0x188a   :  { %v1805_v29 = vld [vmem:[#allocation3 + $0x6] sm:$0x3] }
0x1891   :  { %v2937_v39 = vpop.eup %2936 }
0x1892   :  { %1577 = vrot.lane.b32.xlu1 %v2937_v39, %s3151_s6 }
0x1893   :  { %v2939_v41 = vpop.eup %2938 }
0x1894   :  { %v1567_v42 = vadd.f32 1.0, %v2939_v41 }
0x1896   :  { %2940 = vrcp.f32 %v1567_v42 }
0x18a0   :  { %v2941_v36 = vpop.eup %2940 }
0x18a1   :  { %v1575_v46 = vmul.f32 %v2941_v36, %v1573_v45 }
0x1904   :  { %v1578_v43 = vpop.permute.xlu1 %1577 }
0x1905   :  { %v1580_v44 = vmul.f32 %v2941_v36, %v1578_v43 }
0x1907   :  { %1582 = vrot.lane.b32.xlu1 %v1580_v44, %s3144_s4 }
0x1979   :  { %v1583_v47 = vpop.permute.xlu1 %1582 }
0x197a   :  { %v1585_v48 = vadd.f32 %v1583_v47, %v1575_v46 }
0x197c   :  { %2942 = vtanh.f32 %v1585_v48 }
0x1986   :  { %v2943_v49 = vpop.eup %2942 }
0x1987   :  { %1588 = vrot.lane.b32.xlu0 %v2943_v49, %s3151_s6 }
0x19f9   :  { %v1589_v50 = vpop.permute.xlu0 %1588 }
0x19fa   :  { %v1591_v51 = vmul.f32 %v2941_v36, %v1589_v50 }
0x19fc   :  { %1593 = vrot.lane.b32.xlu1 %v1591_v51, %s3144_s4 }
0x1a6e   :  { %v1594_v52 = vpop.permute.xlu1 %1593 }
0x1a6f   :  { %1596 = vst.msk [vmem:[#allocation10] sm:$0x3] %vm546_vm11, %v1594_v52  ;;  %2672 = vmatmul.mubr.msk.f32.vlgmr.msra.gmra.mrb[12].mxu1 %vm210_vm6, %v1594_v52 }
0x1a70   :  { %2828 = vmatpush3.bf16.msra.mxu1 %v3441_v4  ;;  %2693 = vmatprep.mubr.msk.f32.mxu1 %vm3150_vm9, %v3148_v37 }
0x1a71   :  { %2829 = vmatprep.subr.bf16.mxu1 %v3149_v62 }
0x1a74   :  { %2831 = vmatpush3.bf16.msra.mxu1 %v3447_v6 }
0x1a75   :  { %2838 = vmatprep.subr.bf16.mxu1 %v3149_v62 }
0x1b42   :  { %v1666_v55 = vpop.f32.mrb[12].mxu1 }
0x1b43   :  { %v1670_v56 = vadd.f32 %v1666_v55, %v1597_v54  ;;  %v2673_v57 = vpop.f32.mrb[13].mxu1 }
0x1b45   :  { %2944 = vtanh.f32 %v1670_v56  ;;  %v2426_v59 = vmul.f32 -1.442695, %v1670_v56 }
0x1b47   :  { %2946 = vpow2.f32 %v2426_v59 }
0x1b4f   :  { %v2945_v58 = vpop.eup %2944 }
0x1b50   :  { %1680 = vrot.lane.b32.xlu0 %v2945_v58, %s3151_s6 }
0x1b51   :  { %v2947_v60 = vpop.eup %2946 }
0x1b52   :  { %v1674_v61 = vadd.f32 1.0, %v2947_v60 }
0x1b54   :  { %2948 = vrcp.f32 %v1674_v61 }
0x1b5e   :  { %v2949_v63 = vpop.eup %2948 }
0x1b5f   :  { %v1678_v3 = vmul.f32 %v2949_v63, %v1585_v48  ;;  %v1909_v48 = vld [vmem:[#allocation3 + $0x8] sm:$0x3] }
0x1bc2   :  { %v1681_v0 = vpop.permute.xlu0 %1680 }
0x1bc3   :  { %v1683_v1 = vmul.f32 %v2949_v63, %v1681_v0 }
0x1bc5   :  { %1685 = vrot.lane.b32.xlu1 %v1683_v1, %s3144_s4 }
0x1c37   :  { %v1686_v2 = vpop.permute.xlu1 %1685 }
0x1c38   :  { %v1688_v5 = vadd.f32 %v1686_v2, %v1678_v3 }
0x1c3a   :  { %2950 = vtanh.f32 %v1688_v5 }
0x1c44   :  { %v2951_v7 = vpop.eup %2950 }
0x1c45   :  { %1691 = vrot.lane.b32.xlu0 %v2951_v7, %s3151_s6 }
0x1cb7   :  { %v1692_v8 = vpop.permute.xlu0 %1691 }
0x1cb8   :  { %v1694_v9 = vmul.f32 %v2949_v63, %v1692_v8 }
0x1cba   :  { %1696 = vrot.lane.b32.xlu1 %v1694_v9, %s3144_s4 }
0x1d2c   :  { %v1697_v10 = vpop.permute.xlu1 %1696 }
0x1d2d   :  { %1700 = vst.msk [vmem:[#allocation10 + $0x2] sm:$0x3] %vm546_vm11, %v1697_v10  ;;  %2683 = vmatmul.mubr.msk.f32.vlgmr.msra.gmra.mrb[12].mxu0 %vm210_vm6, %v1697_v10 }
0x1d2e   :  { %2834 = vmatpush3.bf16.msra.mxu0 %v3441_v4  ;;  %2704 = vmatprep.mubr.msk.f32.mxu0 %vm3150_vm9, %v3148_v37 }
0x1d2f   :  { %2835 = vmatprep.subr.bf16.mxu0 %v3149_v62 }
0x1d32   :  { %2837 = vmatpush3.bf16.msra.mxu0 %v3447_v6 }
0x1d33   :  { %2844 = vmatprep.subr.bf16.mxu0 %v3149_v62 }
0x1e00   :  { %v1770_v12 = vpop.f32.mrb[12].mxu0 }
0x1e01   :  { %v1774_v13 = vadd.f32 %v1770_v12, %v1701_v11  ;;  %v2684_v14 = vpop.f32.mrb[13].mxu0 }
0x1e03   :  { %2952 = vtanh.f32 %v1774_v13  ;;  %v2428_v16 = vmul.f32 -1.442695, %v1774_v13 }
0x1e05   :  { %2954 = vpow2.f32 %v2428_v16 }
0x1e0d   :  { %v2953_v15 = vpop.eup %2952 }
0x1e0e   :  { %1784 = vrot.lane.b32.xlu0 %v2953_v15, %s3151_s6 }
0x1e0f   :  { %v2955_v17 = vpop.eup %2954 }
0x1e10   :  { %v1778_v18 = vadd.f32 1.0, %v2955_v17 }
0x1e12   :  { %2956 = vrcp.f32 %v1778_v18 }
0x1e1c   :  { %v2957_v19 = vpop.eup %2956 }
0x1e1d   :  { %v1782_v22 = vmul.f32 %v2957_v19, %v1688_v5  ;;  %v2013_v5 = vld [vmem:[#allocation3 + $0xa] sm:$0x3] }
0x1e80   :  { %v1785_v20 = vpop.permute.xlu0 %1784 }
0x1e81   :  { %v1787_v21 = vmul.f32 %v2957_v19, %v1785_v20  ;;  %v2117_v20 = vld [vmem:[#allocation3 + $0xc] sm:$0x3] }
0x1e83   :  { %1789 = vrot.lane.b32.xlu1 %v1787_v21, %s3144_s4 }
0x1ef5   :  { %v1790_v23 = vpop.permute.xlu1 %1789 }
0x1ef6   :  { %v1792_v24 = vadd.f32 %v1790_v23, %v1782_v22 }
0x1ef8   :  { %2958 = vtanh.f32 %v1792_v24 }
0x1f02   :  { %v2959_v25 = vpop.eup %2958 }
0x1f03   :  { %1795 = vrot.lane.b32.xlu0 %v2959_v25, %s3151_s6 }
0x1f75   :  { %v1796_v26 = vpop.permute.xlu0 %1795 }
0x1f76   :  { %v1798_v27 = vmul.f32 %v2957_v19, %v1796_v26 }
0x1f78   :  { %1800 = vrot.lane.b32.xlu1 %v1798_v27, %s3144_s4 }
0x1fea   :  { %v1801_v28 = vpop.permute.xlu1 %1800 }
0x1feb   :  { %1804 = vst.msk [vmem:[#allocation10 + $0x4] sm:$0x3] %vm546_vm11, %v1801_v28  ;;  %2694 = vmatmul.mubr.msk.f32.vlgmr.msra.gmra.mrb[14].mxu1 %vm210_vm6, %v1801_v28 }
0x1fec   :  { %2840 = vmatpush3.bf16.msra.mxu1 %v3441_v4  ;;  %2715 = vmatprep.mubr.msk.f32.mxu1 %vm3150_vm9, %v3148_v37 }
0x1fed   :  { %2841 = vmatprep.subr.bf16.mxu1 %v3149_v62 }
0x1ff0   :  { %2843 = vmatpush3.bf16.msra.mxu1 %v3447_v6 }
0x1ff1   :  { %2850 = vmatprep.subr.bf16.mxu1 %v3149_v62 }
0x20be   :  { %v1874_v30 = vpop.f32.mrb[14].mxu1 }
0x20bf   :  { %v1878_v31 = vadd.f32 %v1874_v30, %v1805_v29  ;;  %v2695_v32 = vpop.f32.mrb[15].mxu1 }
0x20c1   :  { %2960 = vtanh.f32 %v1878_v31  ;;  %v2430_v34 = vmul.f32 -1.442695, %v1878_v31 }
0x20c3   :  { %2962 = vpow2.f32 %v2430_v34 }
0x20cb   :  { %v2961_v33 = vpop.eup %2960 }
0x20cc   :  { %1888 = vrot.lane.b32.xlu0 %v2961_v33, %s3151_s6 }
0x20cd   :  { %v2963_v35 = vpop.eup %2962 }
0x20ce   :  { %v1882_v38 = vadd.f32 1.0, %v2963_v35 }
0x20d0   :  { %2964 = vrcp.f32 %v1882_v38 }
0x20da   :  { %v2965_v39 = vpop.eup %2964 }
0x20db   :  { %v1886_v42 = vmul.f32 %v2965_v39, %v1792_v24 }
0x213e   :  { %v1889_v40 = vpop.permute.xlu0 %1888 }
0x213f   :  { %v1891_v41 = vmul.f32 %v2965_v39, %v1889_v40  ;;  %v2221_v40 = vld [vmem:[#allocation3 + $0xe] sm:$0x3] }
0x2141   :  { %1893 = vrot.lane.b32.xlu1 %v1891_v41, %s3144_s4 }
0x21b3   :  { %v1894_v36 = vpop.permute.xlu1 %1893 }
0x21b4   :  { %v1896_v43 = vadd.f32 %v1894_v36, %v1886_v42 }
0x21b6   :  { %2966 = vtanh.f32 %v1896_v43 }
0x21c0   :  { %v2967_v44 = vpop.eup %2966 }
0x21c1   :  { %1899 = vrot.lane.b32.xlu0 %v2967_v44, %s3151_s6 }
0x2233   :  { %v1900_v45 = vpop.permute.xlu0 %1899 }
0x2234   :  { %v1902_v46 = vmul.f32 %v2965_v39, %v1900_v45 }
0x2236   :  { %1904 = vrot.lane.b32.xlu1 %v1902_v46, %s3144_s4 }
0x22a8   :  { %v1905_v47 = vpop.permute.xlu1 %1904 }
0x22a9   :  { %1908 = vst.msk [vmem:[#allocation10 + $0x6] sm:$0x3] %vm546_vm11, %v1905_v47  ;;  %2705 = vmatmul.mubr.msk.f32.vlgmr.msra.gmra.mrb[14].mxu0 %vm210_vm6, %v1905_v47 }
0x22aa   :  { %2846 = vmatpush3.bf16.msra.mxu0 %v3441_v4  ;;  %2726 = vmatprep.mubr.msk.f32.mxu0 %vm3150_vm9, %v3148_v37 }
0x22ab   :  { %2847 = vmatprep.subr.bf16.mxu0 %v3149_v62 }
0x22ae   :  { %2849 = vmatpush3.bf16.msra.mxu0 %v3447_v6 }
0x237c   :  { %v1978_v49 = vpop.f32.mrb[14].mxu0 }
0x237d   :  { %v1982_v50 = vadd.f32 %v1978_v49, %v1909_v48  ;;  %v2706_v51 = vpop.f32.mrb[15].mxu0 }
0x237f   :  { %2968 = vtanh.f32 %v1982_v50  ;;  %v2432_v54 = vmul.f32 -1.442695, %v1982_v50 }
0x2381   :  { %2970 = vpow2.f32 %v2432_v54 }
0x2389   :  { %v2969_v52 = vpop.eup %2968 }
0x238a   :  { %1992 = vrot.lane.b32.xlu0 %v2969_v52, %s3151_s6 }
0x238b   :  { %v2971_v55 = vpop.eup %2970 }
0x238c   :  { %v1986_v56 = vadd.f32 1.0, %v2971_v55 }
0x238e   :  { %2972 = vrcp.f32 %v1986_v56 }
0x2398   :  { %v2973_v57 = vpop.eup %2972 }
0x2399   :  { %v1990_v60 = vmul.f32 %v2973_v57, %v1896_v43 }
0x23fc   :  { %v1993_v58 = vpop.permute.xlu0 %1992 }
0x23fd   :  { %v1995_v59 = vmul.f32 %v2973_v57, %v1993_v58 }
0x23ff   :  { %1997 = vrot.lane.b32.xlu1 %v1995_v59, %s3144_s4 }
0x2471   :  { %v1998_v61 = vpop.permute.xlu1 %1997 }
0x2472   :  { %v2000_v63 = vadd.f32 %v1998_v61, %v1990_v60 }
0x2474   :  { %2974 = vtanh.f32 %v2000_v63 }
0x247e   :  { %v2975_v0 = vpop.eup %2974 }
0x247f   :  { %2003 = vrot.lane.b32.xlu0 %v2975_v0, %s3151_s6 }
0x24f1   :  { %v2004_v1 = vpop.permute.xlu0 %2003 }
0x24f2   :  { %v2006_v3 = vmul.f32 %v2973_v57, %v2004_v1 }
0x24f4   :  { %2008 = vrot.lane.b32.xlu1 %v2006_v3, %s3144_s4 }
0x2566   :  { %v2009_v2 = vpop.permute.xlu1 %2008 }
0x2567   :  { %2012 = vst.msk [vmem:[#allocation10 + $0x8] sm:$0x3] %vm546_vm11, %v2009_v2  ;;  %2716 = vmatmul.mubr.msk.f32.vlgmr.msra.gmra.mrb[16].mxu1 %vm210_vm6, %v2009_v2 }
0x2568   :  { %2852 = vmatpush3.bf16.msra.mxu1 %v3441_v4  ;;  %2737 = vmatprep.mubr.msk.f32.mxu1 %vm3150_vm9, %v3148_v37 }
0x2569   :  { %2853 = vmatprep.subr.bf16.mxu1 %v3149_v62 }
0x256c   :  { %2855 = vmatpush3.bf16.msra.mxu1 %v3447_v6 }
0x263a   :  { %v2082_v7 = vpop.f32.mrb[16].mxu1 }
0x263b   :  { %v2086_v8 = vadd.f32 %v2082_v7, %v2013_v5  ;;  %v2717_v9 = vpop.f32.mrb[17].mxu1 }
0x263d   :  { %2976 = vtanh.f32 %v2086_v8  ;;  %v2434_v11 = vmul.f32 -1.442695, %v2086_v8 }
0x263f   :  { %2978 = vpow2.f32 %v2434_v11 }
0x2647   :  { %v2977_v10 = vpop.eup %2976 }
0x2648   :  { %2096 = vrot.lane.b32.xlu0 %v2977_v10, %s3151_s6 }
0x2649   :  { %v2979_v12 = vpop.eup %2978 }
0x264a   :  { %v2090_v13 = vadd.f32 1.0, %v2979_v12 }
0x264c   :  { %2980 = vrcp.f32 %v2090_v13 }
0x2656   :  { %v2981_v4 = vpop.eup %2980 }
0x2657   :  { %v2094_v62 = vmul.f32 %v2981_v4, %v2000_v63 }
0x26ba   :  { %v2097_v14 = vpop.permute.xlu0 %2096 }
0x26bb   :  { %v2099_v37 = vmul.f32 %v2981_v4, %v2097_v14 }
0x26bd   :  { %2101 = vrot.lane.b32.xlu1 %v2099_v37, %s3144_s4 }
0x272f   :  { %v2102_v6 = vpop.permute.xlu1 %2101 }
0x2730   :  { %v2104_v15 = vadd.f32 %v2102_v6, %v2094_v62 }
0x2732   :  { %2982 = vtanh.f32 %v2104_v15 }
0x273c   :  { %v2983_v16 = vpop.eup %2982 }
0x273d   :  { %2107 = vrot.lane.b32.xlu0 %v2983_v16, %s3151_s6 }
0x27af   :  { %v2108_v17 = vpop.permute.xlu0 %2107 }
0x27b0   :  { %v2110_v18 = vmul.f32 %v2981_v4, %v2108_v17 }
0x27b2   :  { %2112 = vrot.lane.b32.xlu1 %v2110_v18, %s3144_s4 }
0x2824   :  { %v2113_v19 = vpop.permute.xlu1 %2112 }
0x2825   :  { %2116 = vst.msk [vmem:[#allocation10 + $0xa] sm:$0x3] %vm546_vm11, %v2113_v19  ;;  %2727 = vmatmul.mubr.msk.f32.vlgmr.msra.gmra.mrb[16].mxu0 %vm210_vm6, %v2113_v19 }
0x28f8   :  { %v2186_v21 = vpop.f32.mrb[16].mxu0 }
0x28f9   :  { %v2190_v22 = vadd.f32 %v2186_v21, %v2117_v20  ;;  %v2728_v23 = vpop.f32.mrb[17].mxu0 }
0x28fb   :  { %2984 = vtanh.f32 %v2190_v22  ;;  %v2436_v25 = vmul.f32 -1.442695, %v2190_v22 }
0x28fd   :  { %2986 = vpow2.f32 %v2436_v25 }
0x2905   :  { %v2985_v24 = vpop.eup %2984 }
0x2906   :  { %2200 = vrot.lane.b32.xlu0 %v2985_v24, %s3151_s6 }
0x2907   :  { %v2987_v26 = vpop.eup %2986 }
0x2908   :  { %v2194_v27 = vadd.f32 1.0, %v2987_v26 }
0x290a   :  { %2988 = vrcp.f32 %v2194_v27 }
0x2914   :  { %v2989_v28 = vpop.eup %2988 }
0x2915   :  { %v2198_v31 = vmul.f32 %v2989_v28, %v2104_v15 }
0x2978   :  { %v2201_v29 = vpop.permute.xlu0 %2200 }
0x2979   :  { %v2203_v30 = vmul.f32 %v2989_v28, %v2201_v29 }
0x297b   :  { %2205 = vrot.lane.b32.xlu1 %v2203_v30, %s3144_s4 }
0x29ed   :  { %v2206_v32 = vpop.permute.xlu1 %2205 }
0x29ee   :  { %v2208_v33 = vadd.f32 %v2206_v32, %v2198_v31 }
0x29f0   :  { %2990 = vtanh.f32 %v2208_v33 }
0x29fa   :  { %v2991_v34 = vpop.eup %2990 }
0x29fb   :  { %2211 = vrot.lane.b32.xlu0 %v2991_v34, %s3151_s6 }
0x2a6d   :  { %v2212_v35 = vpop.permute.xlu0 %2211 }
0x2a6e   :  { %v2214_v38 = vmul.f32 %v2989_v28, %v2212_v35 }
0x2a70   :  { %2216 = vrot.lane.b32.xlu1 %v2214_v38, %s3144_s4 }
0x2ae2   :  { %v2217_v39 = vpop.permute.xlu1 %2216 }
0x2ae3   :  { %2220 = vst.msk [vmem:[#allocation10 + $0xc] sm:$0x3] %vm546_vm11, %v2217_v39  ;;  %2738 = vmatmul.mubr.msk.f32.vlgmr.msra.gmra.mrb[18].mxu1 %vm210_vm6, %v2217_v39 }
0x2bb6   :  { %v2290_v41 = vpop.f32.mrb[18].mxu1 }
0x2bb7   :  { %v2294_v42 = vadd.f32 %v2290_v41, %v2221_v40  ;;  %v2739_v36 = vpop.f32.mrb[19].mxu1 }
0x2bb9   :  { %2992 = vtanh.f32 %v2294_v42  ;;  %v2438_v44 = vmul.f32 -1.442695, %v2294_v42 }
0x2bbb   :  { %2994 = vpow2.f32 %v2438_v44 }
0x2bc3   :  { %v2993_v43 = vpop.eup %2992 }
0x2bc4   :  { %2304 = vrot.lane.b32.xlu0 %v2993_v43, %s3151_s6 }
0x2bc5   :  { %v2995_v45 = vpop.eup %2994 }
0x2bc6   :  { %v2298_v46 = vadd.f32 1.0, %v2995_v45 }
0x2bc8   :  { %2996 = vrcp.f32 %v2298_v46 }
0x2bd2   :  { %v2997_v47 = vpop.eup %2996 }
0x2bd3   :  { %v2302_v50 = vmul.f32 %v2997_v47, %v2208_v33 }
0x2c36   :  { %v2305_v48 = vpop.permute.xlu0 %2304 }
0x2c37   :  { %v2307_v49 = vmul.f32 %v2997_v47, %v2305_v48 }
0x2c39   :  { %2309 = vrot.lane.b32.xlu1 %v2307_v49, %s3144_s4 }
0x2cab   :  { %v2310_v51 = vpop.permute.xlu1 %2309 }
0x2cac   :  { %v2312_v52 = vadd.f32 %v2310_v51, %v2302_v50 }
0x2cae   :  { %2998 = vtanh.f32 %v2312_v52 }
0x2cb8   :  { %v2999_v54 = vpop.eup %2998 }
0x2cb9   :  { %2315 = vrot.lane.b32.xlu0 %v2999_v54, %s3151_s6 }
0x2cbd   :  { %1285 = vrot.lane.b32.xlu0 %v3423_v53, %s3152_s9 }
0x2d2b   :  { %v2316_v55 = vpop.permute.xlu0 %2315 }
0x2d2c   :  { %v2318_v56 = vmul.f32 %v2997_v47, %v2316_v55 }
0x2d2e   :  { %2320 = vrot.lane.b32.xlu1 %v2318_v56, %s3144_s4 }
0x2d2f   :  { %v1286_v57 = vpop.permute.xlu0 %1285 }
0x2d30   :  { %1288 = vst.msk [vmem:[#allocation13] sm:$0x3] %vm546_vm11, %v1286_v57 }
0x2d32   :  { %2328 = vrot.lane.b32.xlu1 %v2312_v52, %s3152_s9 }
0x2da0   :  { %v2321_v58 = vpop.permute.xlu1 %2320 }
0x2da1   :  { %2324 = vst.msk [vmem:[#allocation10 + $0xe] sm:$0x3] %vm546_vm11, %v2321_v58  ;;  %2326 = vst.msk [vmem:[#allocation11 + $0x2] sm:$0x3] %vm546_vm11, %v2321_v58 }
0x2da2   :  { %3077 = shalt.err (!%p3074_p0)
}
0x2da3   :  { %s3078_s2 = scalar_lea.hbm %s3627_s11, 64 }
0x2da4   :  { %p3079_p1 = scmp.ne.s32.totalorder %s3627_s11, %s3078_s2  ;;  %p3082_p2 = scmp.lt.u32.totalorder %s3078_s2, %s3627_s11 }
0x2da6   :  { %p3084_p3 = pnand %p3082_p2, %p3079_p1 }
0x2da8   :  { %3087 = shalt.err (!%p3084_p3)
}
0x2da9   :  { %2356 = dma.vmem_to_hbm [thread:$0]  %s2351_s16, 64, %s3627_s11, [#allocation12], %s3144_s4, %s3144_s4, %s3145_s22  }
0x2daa   :  { %s3088_s29 = scalar_lea.vmem %s3554_s19, 256  ;;  %p3093_p5 = scmp.lt.s32.totalorder %s3554_s19, %s3554_s19 }
0x2dab   :  { %p3089_p4 = scmp.ne.s32.totalorder %s3554_s19, %s3088_s29  ;;  %p3094_p6 = scmp.lt.s32.totalorder %s3088_s29, %s3088_s29 }
0x2dad   :  { %p3095_p7 = por %p3094_p6, %p3093_p5 }
0x2daf   :  { %p3096_p8 = pnand %p3095_p7, %p3089_p4 }
0x2db1   :  { %3099 = shalt.err (!%p3096_p8)
}
0x2db2   :  { %s3100_s13 = scalar_lea.hbm %s3626_s10, 256 }
0x2db3   :  { %p3101_p9 = scmp.ne.s32.totalorder %s3626_s10, %s3100_s13  ;;  %p3104_p10 = scmp.lt.u32.totalorder %s3100_s13, %s3626_s10 }
0x2db5   :  { %p3106_p11 = pnand %p3104_p10, %p3101_p9 }
0x2db7   :  { %3109 = shalt.err (!%p3106_p11)
}
0x2db8   :  { %2344 = dma.vmem_to_hbm [thread:$0]  %s3554_s19, 256, %s3626_s10, [#allocation6], %s3144_s4, %s3144_s4, %s3145_s22   ;;  %v2329_v53 = vpop.permute.xlu1 %2328 }
0x2db9   :  { %2332 = vst.msk [vmem:[#allocation13 + $0x2] sm:$0x3] %vm546_vm11, %v2329_v53  ;;  %s3110_s9 = scalar_lea.vmem %s3558_s21, 64  ;;  %p3115_p13 = scmp.lt.s32.totalorder %s3558_s21, %s3558_s21 }
0x2dba   :  { %p3111_p12 = scmp.ne.s32.totalorder %s3558_s21, %s3110_s9  ;;  %p3116_p0 = scmp.lt.s32.totalorder %s3110_s9, %s3110_s9 }
0x2dbc   :  { %p3117_p1 = por %p3116_p0, %p3115_p13 }
0x2dbe   :  { %p3118_p2 = pnand %p3117_p1, %p3111_p12 }
0x2dc0   :  { %3121 = shalt.err (!%p3118_p2)
}
0x2dc1   :  { %s3122_s17 = scalar_lea.hbm %s3628_s12, 64 }
0x2dc2   :  { %p3123_p3 = scmp.ne.s32.totalorder %s3628_s12, %s3122_s17  ;;  %p3126_p4 = scmp.lt.u32.totalorder %s3122_s17, %s3628_s12 }
0x2dc4   :  { %p3128_p5 = pnand %p3126_p4, %p3123_p3 }
0x2dc6   :  { %3131 = shalt.err (!%p3128_p5)
}
0x2dc7   :  { %2368 = dma.vmem_to_hbm [thread:$0]  %s3558_s21, 64, %s3628_s12, [#allocation12], %s3144_s4, %s3144_s4, %s3145_s22  }
0x2dc8   :  { %3136 = dma.done.wait [#allocation6], 256  }
0x2dc9   :  { %3137 = vsyncadd [#allocation6], 4294967040 }
0x2dca   :  { %3138 = dma.done.wait [#allocation12], 128  }
0x2dcb   :  { %3139 = vsyncadd [#allocation12], 4294967168 }
0x2dcc   :  { %2378 = vsyncpa [#allocation5], 1 }
0x2dcd   :  { %2379 = vsyncpa [#allocation8], 1 }
0x2dce   :  { %2380 = vsyncpa [#allocation6], 1 }
0x2dcf   :  { %2381 = vsyncpa [#allocation12], 1 }

</bundles_post_ra>
